<compile_context>
chip_gen: v6e
topology: v6e:2x2x1
jax: 0.10.0
libtpu: 0.0.40
codegen_flags: <defaults>
</compile_context>

<pallas_src>
import math
import numpy as np
import jax
import jax.numpy as jnp
from jax.experimental import pallas as pl
from jax.experimental.pallas import tpu as pltpu

EPSILON = 1e-09
LOG_EPSILON = math.log(EPSILON)


def _log_sigmoid(x):
    """Numerically stable log(sigmoid(x)) = min(x, 0) - log(1 + exp(-|x|))."""
    return jnp.minimum(x, 0.0) - jnp.log(1.0 + jnp.exp(-jnp.abs(x)))


# ---------------------------------------------------------------------------
# Pallas kernel: contraction + log-sigmoid + reduction hot path (one batch tile)
# ---------------------------------------------------------------------------
def nsl_kernel(pivot_ref, doc_ref, targets_ref, noise_ref, w_ref, out_ref):
    f32 = jnp.float32

    # context_vectors = doc_vectors + pivot_vectors.  Elementwise math in f32
    # (v5e has no bf16 VALU/EUP); the wire/DMA dtype stays whatever came in.
    ctx = doc_ref[...].astype(f32) + pivot_ref[...].astype(f32)        # [TB, D]

    # Batched MXU contraction over the embedding dim D (same pattern as the
    # flash-attention 'bqd,bkd->bqk' einsum).  Keep the matmul operands in the
    # embedding wire dtype (bf16 stays bf16 into the MXU), accumulate in f32.
    mx_dt = targets_ref.dtype
    ctx_mx = ctx.astype(mx_dt)[:, None, :]                             # [TB, 1, D]
    pos = jnp.einsum('bwd,bkd->bwk', targets_ref[...], ctx_mx,
                     preferred_element_type=f32)                       # [TB, W, 1]
    neg = jnp.einsum('bnd,bkd->bnk', noise_ref[...], ctx_mx,
                     preferred_element_type=f32)                       # [TB, N, 1]

    # log(clamp(sigmoid(x), min=eps)) == max(log_sigmoid(x), log(eps))
    # (log is monotone), but with 2 transcendentals instead of 3.
    log_targets = jnp.maximum(_log_sigmoid(pos), LOG_EPSILON)          # [TB, W, 1]
    log_sampled = jnp.maximum(_log_sigmoid(-neg), LOG_EPSILON)         # [TB, N, 1]

    # neg_loss.sum(1) == log_targets.sum(1) + log_sampled_over_(W*S).sum(1)
    per_example = (jnp.sum(log_targets, axis=1)
                   + jnp.sum(log_sampled, axis=1))                     # [TB, 1]

    # Emit weighted per-example partials; the global mean / negation is done in
    # the wrapper so this grid axis is truly independent ("parallel").
    out_ref[...] = w_ref[...].astype(f32) * per_example


# ---------------------------------------------------------------------------
# Wrapper: batch tiling, padding, pallas_call, final reduction
# ---------------------------------------------------------------------------
def _round_up(x, m):
    return ((x + m - 1) // m) * m


def _choose_batch_tile(B, W, N, D, itemsize, budget_bytes=24 << 20):
    """Largest batch tile whose double-buffered working set fits the budget
    (conservative for v7x's 32 MiB scoped / 64 MiB physical VMEM)."""
    d_pad = _round_up(max(D, 1), 128)            # lane padding of the minor dim
    per_row = ((W + N + 2) * d_pad + 2 * 128) * itemsize
    tb = budget_bytes // (2 * per_row)           # x2: BlockSpec double-buffering
    tb = int(max(8, min(tb, 512)))
    tb = (tb // 8) * 8                           # sublane-aligned tile
    tb = min(tb, _round_up(B, 8))
    return max(tb, 8)


def negative_sampling_loss_pallas(pivot_vecs, doc_vecs, target_vecs,
                                  noise_vecs, weights):
    B, D = pivot_vecs.shape
    W = target_vecs.shape[1]
    N = noise_vecs.shape[1]

    itemsize = jnp.dtype(target_vecs.dtype).itemsize
    tb = _choose_batch_tile(B, W, N, D, itemsize)
    b_pad = _round_up(B, tb)

    w2 = weights.reshape(B, 1).astype(jnp.float32)
    if b_pad != B:
        pad = b_pad - B
        pivot_vecs = jnp.pad(pivot_vecs, ((0, pad), (0, 0)))
        doc_vecs = jnp.pad(doc_vecs, ((0, pad), (0, 0)))
        target_vecs = jnp.pad(target_vecs, ((0, pad), (0, 0), (0, 0)))
        noise_vecs = jnp.pad(noise_vecs, ((0, pad), (0, 0), (0, 0)))
        w2 = jnp.pad(w2, ((0, pad), (0, 0)))     # zero weight => padded rows vanish

    grid = (b_pad // tb,)
    partials = pl.pallas_call(
        nsl_kernel,
        out_shape=jax.ShapeDtypeStruct((b_pad, 1), jnp.float32),
        grid=grid,
        in_specs=[
            pl.BlockSpec((tb, D), lambda i: (i, 0)),
            pl.BlockSpec((tb, D), lambda i: (i, 0)),
            pl.BlockSpec((tb, W, D), lambda i: (i, 0, 0)),
            pl.BlockSpec((tb, N, D), lambda i: (i, 0, 0)),
            pl.BlockSpec((tb, 1), lambda i: (i, 0)),
        ],
        out_specs=pl.BlockSpec((tb, 1), lambda i: (i, 0)),
        compiler_params=pltpu.CompilerParams(
            dimension_semantics=("parallel",),
            vmem_limit_bytes=32 * 1024 * 1024),
    )(pivot_vecs, doc_vecs, target_vecs, noise_vecs, w2)

    # (loss_doc_weights * neg_loss.sum(1)).mean().neg()  -- divide by global B.
    return -(jnp.sum(partials) / B)


# ---------------------------------------------------------------------------
# AliasMultinomial (table built in numpy, draws done deterministically in JAX)
# ---------------------------------------------------------------------------
def build_alias_table(probs):
    probs = np.asarray(probs, dtype=np.float64)
    K = len(probs)
    q = np.zeros(K, dtype=np.float64)
    J = np.zeros(K, dtype=np.int64)
    smaller, larger = [], []
    for kk, prob in enumerate(probs):
        q[kk] = K * prob
        (smaller if q[kk] < 1.0 else larger).append(kk)
    while smaller and larger:
        small = smaller.pop()
        large = larger.pop()
        J[small] = large
        q[large] = q[large] - 1.0 + q[small]
        (smaller if q[large] < 1.0 else larger).append(large)
    return np.clip(q, 0.0, 1.0), np.clip(J, 0, K - 1)


def alias_draw(key, q, J, n):
    K = q.shape[0]
    k_r, k_b = jax.random.split(key)
    r = jax.random.randint(k_r, (n,), 0, K)
    qr = q[r]
    jr = J[r]
    b = jax.random.bernoulli(k_b, qr).astype(jnp.int32)
    return r * b + jr * (1 - b)


# ---------------------------------------------------------------------------
# Demo / test
# ---------------------------------------------------------------------------
if __name__ == "__main__":
    # Small shapes consistent with the module; D = 128 keeps the embedding dim
    # lane-aligned (recommended production layout).
    vocab_size = 64
    embedding_dim = 128
    batch_size = 8
    window_size = 4
    num_sampled = 10

    key = jax.random.PRNGKey(0)
    k_emb, k_dist, k_piv, k_tgt, k_doc, k_w, k_noise = jax.random.split(key, 7)

    # Deterministic "parameters" (module __init__): word vectors + distribution.
    word_vectors = jax.random.normal(k_emb, (vocab_size, embedding_dim),
                                     dtype=jnp.float32) * 0.1
    raw = jax.random.uniform(k_dist, (vocab_size,), dtype=jnp.float32) + 0.1
    word_distribution = np.asarray(raw / raw.sum())

    q_tab, J_tab = build_alias_table(word_distribution)
    q_tab = jnp.asarray(q_tab, dtype=jnp.float32)
    J_tab = jnp.asarray(J_tab, dtype=jnp.int32)

    # Forward inputs.
    pivot_words = jax.random.randint(k_piv, (batch_size,), 0, vocab_size)
    target_words = jax.random.randint(k_tgt, (batch_size, window_size),
                                      0, vocab_size)
    doc_vectors = jax.random.normal(k_doc, (batch_size, embedding_dim),
                                    dtype=jnp.float32) * 0.1
    loss_doc_weights = jax.random.uniform(k_w, (batch_size,),
                                          dtype=jnp.float32)

    # Glue in plain JAX: embedding gathers + alias-multinomial noise draws.
    # TODO(synk): the embedding gather could be moved in-kernel (indices via
    # scalar prefetch + DMA gather) to avoid materializing noise_vecs in HBM.
    pivot_vecs = word_vectors[pivot_words]                       # [B, D]
    target_vecs = word_vectors[target_words]                     # [B, W, D]
    noise_idx = alias_draw(k_noise, q_tab, J_tab,
                           batch_size * window_size * num_sampled)
    noise_idx = noise_idx.reshape(batch_size, window_size * num_sampled)
    noise_vecs = word_vectors[noise_idx]                         # [B, W*S, D]

    loss = negative_sampling_loss_pallas(pivot_vecs, doc_vectors,
                                         target_vecs, noise_vecs,
                                         loss_doc_weights)
    jax.block_until_ready(loss)

    # Pure-JAX reference (original PyTorch formulation) for a sanity check.
    ctx = doc_vectors + pivot_vecs
    pos = jnp.sum(target_vecs * ctx[:, None, :], axis=2)
    log_t = jnp.log(jnp.maximum(jax.nn.sigmoid(pos), EPSILON))
    neg = jnp.sum(noise_vecs * ctx[:, None, :], axis=2)
    log_n = jnp.log(jnp.maximum(jax.nn.sigmoid(-neg), EPSILON))
    per_b = log_t.sum(1) + log_n.sum(1)
    ref = -jnp.mean(loss_doc_weights * per_b)

    np.testing.assert_allclose(np.asarray(loss), np.asarray(ref),
                               rtol=1e-5, atol=1e-5)
    print("KERNEL_OK")
</pallas_src>

<mosaic_0001>
module attributes {stable_mosaic.version = 11 : i64} {
  func.func @nsl_kernel(%arg0: i32, %arg1: memref<8x128xf32, #tpu.memory_space<vmem>>, %arg2: memref<8x128xf32, #tpu.memory_space<vmem>>, %arg3: memref<8x4x128xf32, #tpu.memory_space<vmem>>, %arg4: memref<8x40x128xf32, #tpu.memory_space<vmem>>, %arg5: memref<8x1xf32, #tpu.memory_space<vmem>>, %arg6: memref<8x1xf32, #tpu.memory_space<vmem>>) attributes {dimension_semantics = [#tpu.dimension_semantics<parallel>], iteration_bounds = array<i64: 1>, scalar_prefetch = 0 : i64, scratch_operands = 0 : i64, tpu.core_type = #tpu.core_type<tc>, window_params = [{transform_indices = @transform_0, window_bounds = array<i64: 8, 128>}, {transform_indices = @transform_1, window_bounds = array<i64: 8, 128>}, {transform_indices = @transform_2, window_bounds = array<i64: 8, 4, 128>}, {transform_indices = @transform_3, window_bounds = array<i64: 8, 40, 128>}, {transform_indices = @transform_4, window_bounds = array<i64: 8, 1>}, {transform_indices = @transform_5, window_bounds = array<i64: 8, 1>}]} {
    %c0 = arith.constant 0 : index
    %c0_0 = arith.constant 0 : index
    %0 = vector.load %arg2[%c0, %c0_0] : memref<8x128xf32, #tpu.memory_space<vmem>>, vector<8x128xf32>
    %c0_1 = arith.constant 0 : index
    %c0_2 = arith.constant 0 : index
    %1 = vector.load %arg1[%c0_1, %c0_2] : memref<8x128xf32, #tpu.memory_space<vmem>>, vector<8x128xf32>
    %2 = arith.addf %0, %1 : vector<8x128xf32>
    %3 = vector.shape_cast %2 : vector<8x128xf32> to vector<8x1x128xf32>
    %c0_3 = arith.constant 0 : index
    %c0_4 = arith.constant 0 : index
    %c0_5 = arith.constant 0 : index
    %4 = vector.load %arg3[%c0_3, %c0_4, %c0_5] : memref<8x4x128xf32, #tpu.memory_space<vmem>>, vector<8x4x128xf32>
    "tpu.trace_start"() <{level = 10 : i32, message = "bwd,bkd->bwk"}> : () -> ()
    %cst = arith.constant dense<0.000000e+00> : vector<8x4x1xf32>
    %5 = tpu.matmul %4, %3, %cst {dimension_numbers = #tpu.dot_dimension_numbers<[2], [2], [1], [1], [0, 0, 0, 1, 1, 1], [0], [0]>} : vector<8x4x128xf32>, vector<8x1x128xf32>, vector<8x4x1xf32> -> vector<8x4x1xf32>
    "tpu.trace_stop"() : () -> ()
    %c0_6 = arith.constant 0 : index
    %c0_7 = arith.constant 0 : index
    %c0_8 = arith.constant 0 : index
    %6 = vector.load %arg4[%c0_6, %c0_7, %c0_8] : memref<8x40x128xf32, #tpu.memory_space<vmem>>, vector<8x40x128xf32>
    "tpu.trace_start"() <{level = 10 : i32, message = "bnd,bkd->bnk"}> : () -> ()
    %cst_9 = arith.constant dense<0.000000e+00> : vector<8x40x1xf32>
    %7 = tpu.matmul %6, %3, %cst_9 {dimension_numbers = #tpu.dot_dimension_numbers<[2], [2], [1], [1], [0, 0, 0, 1, 1, 1], [0], [0]>} : vector<8x40x128xf32>, vector<8x1x128xf32>, vector<8x40x1xf32> -> vector<8x40x1xf32>
    "tpu.trace_stop"() : () -> ()
    %cst_10 = arith.constant 0.000000e+00 : f32
    %8 = vector.broadcast %cst_10 : f32 to vector<8x4x1xf32>
    %9 = arith.minimumf %5, %8 : vector<8x4x1xf32>
    %10 = math.absf %5 : vector<8x4x1xf32>
    %cst_11 = arith.constant 0.000000e+00 : f32
    %11 = vector.broadcast %cst_11 : f32 to vector<8x4x1xf32>
    %12 = arith.subf %11, %10 : vector<8x4x1xf32>
    %13 = math.exp %12 : vector<8x4x1xf32>
    %cst_12 = arith.constant 1.000000e+00 : f32
    %14 = vector.broadcast %cst_12 : f32 to vector<8x4x1xf32>
    %15 = arith.addf %14, %13 : vector<8x4x1xf32>
    %16 = math.log %15 : vector<8x4x1xf32>
    %17 = arith.subf %9, %16 : vector<8x4x1xf32>
    %cst_13 = arith.constant -20.7232666 : f32
    %18 = vector.broadcast %cst_13 : f32 to vector<8x4x1xf32>
    %19 = arith.maximumf %17, %18 : vector<8x4x1xf32>
    %cst_14 = arith.constant 0.000000e+00 : f32
    %20 = vector.broadcast %cst_14 : f32 to vector<8x40x1xf32>
    %21 = arith.subf %20, %7 : vector<8x40x1xf32>
    %cst_15 = arith.constant 0.000000e+00 : f32
    %22 = vector.broadcast %cst_15 : f32 to vector<8x40x1xf32>
    %23 = arith.minimumf %21, %22 : vector<8x40x1xf32>
    %24 = math.absf %21 : vector<8x40x1xf32>
    %cst_16 = arith.constant 0.000000e+00 : f32
    %25 = vector.broadcast %cst_16 : f32 to vector<8x40x1xf32>
    %26 = arith.subf %25, %24 : vector<8x40x1xf32>
    %27 = math.exp %26 : vector<8x40x1xf32>
    %cst_17 = arith.constant 1.000000e+00 : f32
    %28 = vector.broadcast %cst_17 : f32 to vector<8x40x1xf32>
    %29 = arith.addf %28, %27 : vector<8x40x1xf32>
    %30 = math.log %29 : vector<8x40x1xf32>
    %31 = arith.subf %23, %30 : vector<8x40x1xf32>
    %cst_18 = arith.constant -20.7232666 : f32
    %32 = vector.broadcast %cst_18 : f32 to vector<8x40x1xf32>
    %33 = arith.maximumf %31, %32 : vector<8x40x1xf32>
    %cst_19 = arith.constant dense<0.000000e+00> : vector<8x1xf32>
    %34 = vector.multi_reduction <add>, %19, %cst_19 [1] : vector<8x4x1xf32> to vector<8x1xf32>
    %cst_20 = arith.constant dense<0.000000e+00> : vector<8x1xf32>
    %35 = vector.multi_reduction <add>, %33, %cst_20 [1] : vector<8x40x1xf32> to vector<8x1xf32>
    %36 = arith.addf %34, %35 : vector<8x1xf32>
    %c0_21 = arith.constant 0 : index
    %c0_22 = arith.constant 0 : index
    %37 = vector.load %arg5[%c0_21, %c0_22] : memref<8x1xf32, #tpu.memory_space<vmem>>, vector<8x1xf32>
    %38 = arith.mulf %37, %36 : vector<8x1xf32>
    %c0_23 = arith.constant 0 : index
    %c0_24 = arith.constant 0 : index
    %39 = vector.load %arg6[%c0_23, %c0_24] : memref<8x1xf32, #tpu.memory_space<vmem>>, vector<8x1xf32>
    tpu.vector_store %arg6[%c0_23, %c0_24], %38 {strides = array<i32>} : memref<8x1xf32, #tpu.memory_space<vmem>>, vector<8x1xf32>,
    return
  }
  func.func @transform_0(%arg0: i32) -> (i32, i32) {
    %c0_i32 = arith.constant 0 : i32
    %c0_i32_0 = arith.constant 0 : i32
    return %arg0, %c0_i32 : i32, i32
  }
  func.func @transform_1(%arg0: i32) -> (i32, i32) {
    %c0_i32 = arith.constant 0 : i32
    %c0_i32_0 = arith.constant 0 : i32
    return %arg0, %c0_i32 : i32, i32
  }
  func.func @transform_2(%arg0: i32) -> (i32, i32, i32) {
    %c0_i32 = arith.constant 0 : i32
    %c0_i32_0 = arith.constant 0 : i32
    %c0_i32_1 = arith.constant 0 : i32
    return %arg0, %c0_i32, %c0_i32_0 : i32, i32, i32
  }
  func.func @transform_3(%arg0: i32) -> (i32, i32, i32) {
    %c0_i32 = arith.constant 0 : i32
    %c0_i32_0 = arith.constant 0 : i32
    %c0_i32_1 = arith.constant 0 : i32
    return %arg0, %c0_i32, %c0_i32_0 : i32, i32, i32
  }
  func.func @transform_4(%arg0: i32) -> (i32, i32) {
    %c0_i32 = arith.constant 0 : i32
    %c0_i32_0 = arith.constant 0 : i32
    return %arg0, %c0_i32 : i32, i32
  }
  func.func @transform_5(%arg0: i32) -> (i32, i32) {
    %c0_i32 = arith.constant 0 : i32
    %c0_i32_0 = arith.constant 0 : i32
    return %arg0, %c0_i32 : i32, i32
  }
}

</mosaic_0001>

<bundles_post_ra>
// kernel: tpu_custom_call.1
= control target key start
LH: loop header
LB: loop body
LE: loop exit
PB: predicated region body
PF: predicated region fallthrough
CT: control target
= control target key end

     0   :  { %10 = vsyncpa [#allocation3], 0  ;;  %s2000_s0 = inlined_call_operand.vmem [shape: f32[8,128], index: 0, kind: input, shape index: {}]   ;;  %s2001_s1 = inlined_call_operand.hbm [shape: f32[8,128], index: 1, kind: input, shape index: {}]   ;;  %s2002_s2 = inlined_call_operand.hbm [shape: f32[8,4,128], index: 2, kind: input, shape index: {}]   ;;  %s2003_s3 = inlined_call_operand.hbm [shape: f32[8,40,128], index: 3, kind: input, shape index: {}]   ;;  %s2004_s4 = inlined_call_operand.vmem [shape: f32[8,1], index: 4, kind: input, shape index: {}]   ;;  %s2005_s5 = inlined_call_operand.vmem [shape: f32[8,1], index: 5, kind: output, shape index: {}]  }
   0x1   :  { %11 = vsyncpa [#allocation5], 0  ;;  %s1355_s18 = smov [#allocation4]  }
   0x2   :  { %s29_s19 = sshll.u32 %s1355_s18, 4  ;;  %s30_s19 = int_to_ptr.vmem [resolvable:$true] %s29_s19 }
   0x3   :  { %s1299_s20 = scalar_lea.vmem %s30_s19, 512  ;;  %p1304_p1 = scmp.lt.s32.totalorder %s30_s19, %s30_s19 }
   0x4   :  { %p1300_p0 = scmp.ne.s32.totalorder %s30_s19, %s1299_s20  ;;  %p1305_p2 = scmp.lt.s32.totalorder %s1299_s20, %s1299_s20 }
   0x6   :  { %p1306_p3 = por %p1305_p2, %p1304_p1 }
   0x8   :  { %p1307_p4 = pnand %p1306_p3, %p1300_p0 }
   0xa   :  { %1310 = shalt.err (!%p1307_p4)
}
   0xb   :  { %s1356_s21 = smov 64   ;;  %s1357_s22 = smov 4  }
   0xc   :  { %35 = dma.hbm_to_vmem [thread:$0]  %s2002_s2, 512, %s30_s19, [#allocation5], %s1356_s21, %s1356_s21, %s1357_s22  }
   0xd   :  { %s1358_s25 = smov [#allocation2]   ;;  %s1359_s27 = smov [#allocation6]  }
   0xe   :  { %s20_s26 = sshll.u32 %s1358_s25, 4  ;;  %s41_s28 = sshll.u32 %s1359_s27, 4  ;;  %s21_s26 = int_to_ptr.vmem [resolvable:$true] %s20_s26  ;;  %s42_s28 = int_to_ptr.vmem [resolvable:$true] %s41_s28 }
   0xf   :  { %s1319_s29 = scalar_lea.vmem %s21_s26, 128  ;;  %p1324_p6 = scmp.lt.s32.totalorder %s21_s26, %s21_s26 }
  0x10   :  { %p1320_p5 = scmp.ne.s32.totalorder %s21_s26, %s1319_s29  ;;  %p1325_p7 = scmp.lt.s32.totalorder %s1319_s29, %s1319_s29 }
  0x12   :  { %p1326_p8 = por %p1325_p7, %p1324_p6 }
  0x14   :  { %p1327_p9 = pnand %p1326_p8, %p1320_p5 }
  0x16   :  { %1330 = shalt.err (!%p1327_p9)
}
  0x17   :  { %23 = dma.hbm_to_vmem [thread:$0]  %s2001_s1, 128, %s21_s26, [#allocation3]  }
  0x18   :  { %s1339_s7 = scalar_lea.vmem %s42_s28, 5120  ;;  %p1344_p11 = scmp.lt.s32.totalorder %s42_s28, %s42_s28 }
  0x19   :  { %p1340_p10 = scmp.ne.s32.totalorder %s42_s28, %s1339_s7  ;;  %p1345_p12 = scmp.lt.s32.totalorder %s1339_s7, %s1339_s7 }
  0x1b   :  { %p1346_p13 = por %p1345_p12, %p1344_p11 }
  0x1d   :  { %p1347_p0 = pnand %p1346_p13, %p1340_p10 }
  0x1f   :  { %1350 = shalt.err (!%p1347_p0)
}
  0x20   :  { %s1360_s2 = smov 128   ;;  %s1361_s8 = smov 8  }
  0x21   :  { %47 = dma.hbm_to_vmem [thread:$0]  %s2003_s3, 5120, %s42_s28, [#allocation5], %s1360_s2, %s1360_s2, %s1361_s8  }
  0x22   :  { %1351 = dma.done.wait [#allocation3], 128  }
  0x23   :  { %1352 = vsyncadd [#allocation3], 4294967168 }
  0x24   :  { %1353 = dma.done.wait [#allocation5], 5632  }
  0x25   :  { %1354 = vsyncadd [#allocation5], 4294961664  ;;  %v67_v0 = vlaneseq  ;;  %v1362_v1 = vmov 1966171168   ;;  %v59_v6 = vld [vmem:[#allocation2] sm:$0xff]  ;;  %v193_v13 = vld [vmem:[#allocation6] sm:$0xff] }
  0x26   :  { %v65_v2 = vunpack.c.l.s4 %v1362_v1  ;;  %v60_v7 = vld [vmem:[%s2000_s0] sm:$0xff]  ;;  %v198_v16 = vld [vmem:[#allocation6 + $0x28] sm:$0xff]  ;;  %v199_v22 = vld [vmem:[#allocation6 + $0x30] sm:$0xff]  ;;  %vm126_vm0 = vcmask 1043456   ;;  %vm930_vm1 = vcmask 7168   ;;  %vm873_vm2 = vcmask 3072  }
  0x27   :  { %v68_v3 = vshrl.u32 %v67_v0, 7  ;;  %v61_v8 = vadd.f32 %v60_v7, %v59_v6  ;;  %v194_v17 = vld [vmem:[#allocation6 + $0x8] sm:$0xff]  ;;  %v195_v25 = vld [vmem:[#allocation6 + $0x10] sm:$0xff]  ;;  %v204_v29 = vld [vmem:[#allocation6 + $0x58] sm:$0xff]  ;;  %vm1068_vm3 = vcmask 1041409   ;;  %vm1070_vm4 = vcmask 1042434  }
  0x28   :  { %v66_v4 = vunpack.c.0.s8 %v65_v2  ;;  %v203_v31 = vld [vmem:[#allocation6 + $0x50] sm:$0xff]  ;;  %v200_v34 = vld [vmem:[#allocation6 + $0x38] sm:$0xff]  ;;  %v205_v37 = vld [vmem:[#allocation6 + $0x60] sm:$0xff]  ;;  %vm1072_vm5 = vcmask 1043459   ;;  %vm1074_vm6 = vcmask 1044484   ;;  %vm1076_vm7 = vcmask 1045509  }
  0x29   :  { %v1405_v10 = vsub.s32 0, %v68_v3  ;;  %v63_v21 = vcombine.high %v61_v8, %v61_v8  ;;  %v213_v40 = vld [vmem:[#allocation6 + $0xa0] sm:$0xff]  ;;  %v208_v43 = vld [vmem:[#allocation6 + $0x78] sm:$0xff]  ;;  %v214_v48 = vld [vmem:[#allocation6 + $0xa8] sm:$0xff]  ;;  %vm1078_vm8 = vcmask 1046534   ;;  %vm1080_vm9 = vcmask 1047559  }
  0x2a   :  { %v69_v5 = vsub.s32 %v66_v4, %v68_v3  ;;  %v209_v45 = vld [vmem:[#allocation6 + $0x80] sm:$0xff]  ;;  %v196_v50 = vld [vmem:[#allocation6 + $0x18] sm:$0xff]  ;;  %v210_v55 = vld [vmem:[#allocation6 + $0x88] sm:$0xff] }
  0x2b   :  { %v201_v53 = vld [vmem:[#allocation6 + $0x40] sm:$0xff]  ;;  %v218_v58 = vld [vmem:[#allocation6 + $0xc8] sm:$0xff]  ;;  %v219_v60 = vld [vmem:[#allocation6 + $0xd0] sm:$0xff] }
  0x2c   :  { %v70_v9 = vrot.slane %v61_v8, %v69_v5  ;;  %v77_v28 = vrot.slane %v63_v21, %v69_v5  ;;  %v206_v63 = vld [vmem:[#allocation6 + $0x68] sm:$0xff]  ;;  %v215_v1 = vld [vmem:[#allocation6 + $0xb0] sm:$0xff]  ;;  %v224_v6 = vld [vmem:[#allocation6 + $0xf8] sm:$0xff] }
  0x2d   :  { %v223_v4 = vld [vmem:[#allocation6 + $0xf0] sm:$0xff]  ;;  %v197_v8 = vld [vmem:[#allocation6 + $0x20] sm:$0xff]  ;;  %v228_v21 = vld [vmem:[#allocation6 + $0x118] sm:$0xff] }
  0x2e   :  { %v86_v11 = vrot.slane %v70_v9, %v69_v5  ;;  %v78_v12 = vcombine.high %v70_v9, %v70_v9  ;;  %v93_v33 = vrot.slane %v77_v28, %v69_v5  ;;  %v79_v47 = vcombine.high %v77_v28, %v77_v28  ;;  %v216_v28 = vld [vmem:[#allocation6 + $0xb8] sm:$0xff] }
  0x30   :  { %v1408_v14 = vrot.slane %v86_v11, %v1405_v10  ;;  %v100_v15 = vrot.slane %v78_v12, %v69_v5  ;;  %v108_v20 = vcombine.high %v86_v11, %v86_v11  ;;  %v1425_v39 = vrot.slane %v93_v33, %v1405_v10  ;;  %v202_v11 = vld [vmem:[#allocation6 + $0x48] sm:$0xff] }
  0x31   :  { %v107_v52 = vrot.slane %v79_v47, %v69_v5  ;;  %v109_v62 = vcombine.high %v93_v33, %v93_v33  ;;  %v221_v33 = vld [vmem:[#allocation6 + $0xe0] sm:$0xff] }
  0x32   :  { %v233_v18 = vmul.f32 %v193_v13, %v1408_v14  ;;  %v1412_v19 = vrot.slane %v100_v15, %v1405_v10  ;;  %v234_v24 = vmul.f32 %v194_v17, %v1408_v14  ;;  %v1418_v27 = vrot.slane %v108_v20, %v1405_v10  ;;  %v220_v17 = vld [vmem:[#allocation6 + $0xd8] sm:$0xff] }
  0x33   :  { %v235_v30 = vmul.f32 %v195_v25, %v1408_v14  ;;  %v110_v36 = vcombine.high %v100_v15, %v100_v15  ;;  %v293_v44 = vmul.f32 %v213_v40, %v1425_v39  ;;  %v294_v51 = vmul.f32 %v214_v48, %v1425_v39  ;;  %v211_v15 = vld [vmem:[#allocation6 + $0x90] sm:$0xff]  ;;  %v112_v40 = vld [vmem:[#allocation4] sm:$0xf] }
  0x34   :  { %238 = vadd.xlane.f32.xlu0 %v233_v18  ;;  %v248_v23 = vmul.f32 %v198_v16, %v1412_v19  ;;  %v249_v26 = vmul.f32 %v199_v22, %v1412_v19  ;;  %v264_v32 = vmul.f32 %v204_v29, %v1418_v27  ;;  %v263_v35 = vmul.f32 %v203_v31, %v1418_v27  ;;  %v207_v25 = vld [vmem:[#allocation6 + $0x70] sm:$0xff]  ;;  %v212_v31 = vld [vmem:[#allocation6 + $0x98] sm:$0xff] }
  0x35   :  { %v250_v38 = vmul.f32 %v200_v34, %v1412_v19  ;;  %v265_v41 = vmul.f32 %v205_v37, %v1418_v27  ;;  %v1429_v42 = vrot.slane %v110_v36, %v1405_v10  ;;  %v236_v54 = vmul.f32 %v196_v50, %v1408_v14  ;;  %v217_v37 = vld [vmem:[#allocation6 + $0xc0] sm:$0xff]  ;;  %v114_v50 = vld [vmem:[#allocation4 + $0x8] sm:$0xf] }
  0x36   :  { %253 = vadd.xlane.f32.xlu1 %v248_v23  ;;  %v251_v56 = vmul.f32 %v201_v53, %v1412_v19  ;;  %v1438_v57 = vrot.slane %v107_v52, %v1405_v10  ;;  %v266_v2 = vmul.f32 %v206_v63, %v1418_v27  ;;  %v1445_v3 = vrot.slane %v109_v62, %v1405_v10  ;;  %v229_v23 = vld [vmem:[#allocation6 + $0x120] sm:$0xff]  ;;  %v117_v62 = vld [vmem:[#allocation4 + $0x14] sm:$0xf] }
  0x37   :  { %v278_v46 = vmul.f32 %v208_v43, %v1429_v42  ;;  %v279_v49 = vmul.f32 %v209_v45, %v1429_v42  ;;  %v280_v59 = vmul.f32 %v210_v55, %v1429_v42  ;;  %v295_v5 = vmul.f32 %v215_v1, %v1425_v39  ;;  %v115_v55 = vld [vmem:[#allocation4 + $0xc] sm:$0xf]  ;;  %v118_v1 = vld [vmem:[#allocation4 + $0x18] sm:$0xf] }
  0x38   :  { %240 = vadd.xlane.f32.xlu0 %v234_v24  ;;  %v308_v61 = vmul.f32 %v218_v58, %v1438_v57  ;;  %v309_v0 = vmul.f32 %v219_v60, %v1438_v57  ;;  %v323_v7 = vmul.f32 %v223_v4, %v1445_v3  ;;  %v324_v9 = vmul.f32 %v224_v6, %v1445_v3  ;;  %v116_v60 = vld [vmem:[#allocation4 + $0x10] sm:$0xf]  ;;  %v119_v4 = vld [vmem:[#allocation4 + $0x1c] sm:$0xf] }
  0x39   :  { %v237_v12 = vmul.f32 %v197_v8, %v1408_v14  ;;  %v111_v13 = vcombine.high %v107_v52, %v107_v52  ;;  %v252_v16 = vmul.f32 %v202_v11, %v1412_v19  ;;  %v281_v18 = vmul.f32 %v211_v15, %v1429_v42  ;;  %v231_v52 = vld [vmem:[#allocation6 + $0x130] sm:$0xff] }
  0x3a   :  { %255 = vadd.xlane.f32.xlu1 %v249_v26  ;;  %v310_v22 = vmul.f32 %v220_v17, %v1438_v57  ;;  %v267_v29 = vmul.f32 %v207_v25, %v1418_v27  ;;  %v282_v34 = vmul.f32 %v212_v31, %v1429_v42  ;;  %v311_v36 = vmul.f32 %v221_v33, %v1438_v57 }
  0x3b   :  { %v1454_v20 = vrot.slane %v111_v13, %v1405_v10  ;;  %v296_v10 = vmul.f32 %v216_v28, %v1425_v39  ;;  %v297_v43 = vmul.f32 %v217_v37, %v1425_v39  ;;  %v125_v45 = vmul.f32 %v1408_v14, %v112_v40 }
  0x3c   :  { %242 = vadd.xlane.f32.xlu0 %v235_v30  ;;  %v225_v30 = vld [vmem:[#allocation6 + $0x100] sm:$0xff]  ;;  %v144_v14 = vmul.f32 %v1418_v27, %v114_v50  ;;  %v153_v58 = vmul.f32 %v1429_v42, %v115_v55  ;;  %v162_v27 = vmul.f32 %v1425_v39, %v116_v60 }
  0x3d   :  { %v338_v24 = vmul.f32 %v228_v21, %v1454_v20  ;;  %v339_v26 = vmul.f32 %v229_v23, %v1454_v20  ;;  %v127_v48 = vsel %vm126_vm0, %v125_v45, 0.0 }
  0x3e   :  { %270 = vadd.xlane.f32.xlu1 %v264_v32  ;;  %v325_v32 = vmul.f32 %v225_v30, %v1445_v3  ;;  %v154_v63 = vsel %vm126_vm0, %v153_v58, 0.0  ;;  %v163_v42 = vsel %vm126_vm0, %v162_v27, 0.0 }
  0x40   :  { %268 = vadd.xlane.f32.xlu0 %v263_v35  ;;  %v230_v35 = vld [vmem:[#allocation6 + $0x128] sm:$0xff] }
  0x42   :  { %257 = vadd.xlane.f32.xlu1 %v250_v38  ;;  %v340_v38 = vmul.f32 %v230_v35, %v1454_v20 }
  0x44   :  { %272 = vadd.xlane.f32.xlu0 %v265_v41  ;;  %v226_v41 = vld [vmem:[#allocation6 + $0x108] sm:$0xff] }
  0x46   :  { %298 = vadd.xlane.f32.xlu1 %v293_v44  ;;  %v113_v44 = vld [vmem:[#allocation4 + $0x4] sm:$0xf] }
  0x47   :  { %v135_v47 = vmul.f32 %v1412_v19, %v113_v44  ;;  %v145_v19 = vsel %vm126_vm0, %v144_v14, 0.0 }
  0x48   :  { %283 = vadd.xlane.f32.xlu0 %v278_v46  ;;  %v326_v46 = vmul.f32 %v226_v41, %v1445_v3 }
  0x4a   :  { %285 = vadd.xlane.f32.xlu1 %v279_v49  ;;  %v222_v49 = vld [vmem:[#allocation6 + $0xe8] sm:$0xff] }
  0x4b   :  { %v312_v53 = vmul.f32 %v222_v49, %v1438_v57 }
  0x4c   :  { %300 = vadd.xlane.f32.xlu0 %v294_v51  ;;  %v136_v51 = vsel %vm126_vm0, %v135_v47, 0.0 }
  0x4e   :  { %244 = vadd.xlane.f32.xlu1 %v236_v54  ;;  %v341_v54 = vmul.f32 %v231_v52, %v1454_v20 }
  0x50   :  { %259 = vadd.xlane.f32.xlu0 %v251_v56  ;;  %v227_v56 = vld [vmem:[#allocation6 + $0x110] sm:$0xff] }
  0x52   :  { %287 = vadd.xlane.f32.xlu1 %v280_v59  ;;  %v327_v59 = vmul.f32 %v227_v56, %v1445_v3 }
  0x54   :  { %313 = vadd.xlane.f32.xlu0 %v308_v61  ;;  %v232_v61 = vld [vmem:[#allocation6 + $0x138] sm:$0xff] }
  0x56   :  { %315 = vadd.xlane.f32.xlu1 %v309_v0  ;;  %v342_v0 = vmul.f32 %v232_v61, %v1454_v20 }
  0x58   :  { %274 = vadd.xlane.f32.xlu0 %v266_v2  ;;  %v171_v2 = vmul.f32 %v1438_v57, %v117_v62 }
  0x5a   :  { %302 = vadd.xlane.f32.xlu1 %v295_v5  ;;  %v180_v5 = vmul.f32 %v1445_v3, %v118_v1  ;;  %v172_v6 = vsel %vm126_vm0, %v171_v2, 0.0 }
  0x5c   :  { %328 = vadd.xlane.f32.xlu0 %v323_v7  ;;  %v189_v7 = vmul.f32 %v1454_v20, %v119_v4  ;;  %v181_v39 = vsel %vm126_vm0, %v180_v5, 0.0 }
  0x5e   :  { %330 = vadd.xlane.f32.xlu1 %v324_v9  ;;  %v190_v8 = vsel %vm126_vm0, %v189_v7, 0.0 }
  0x60   :  { %246 = vadd.xlane.f32.xlu0 %v237_v12 }
  0x62   :  { %261 = vadd.xlane.f32.xlu1 %v252_v16 }
  0x64   :  { %289 = vadd.xlane.f32.xlu0 %v281_v18 }
  0x66   :  { %317 = vadd.xlane.f32.xlu1 %v310_v22 }
  0x68   :  { %343 = vadd.xlane.f32.xlu0 %v338_v24 }
  0x6a   :  { %345 = vadd.xlane.f32.xlu1 %v339_v26 }
  0x6c   :  { %276 = vadd.xlane.f32.xlu0 %v267_v29 }
  0x6e   :  { %304 = vadd.xlane.f32.xlu1 %v296_v10 }
  0x70   :  { %332 = vadd.xlane.f32.xlu0 %v325_v32 }
  0x72   :  { %291 = vadd.xlane.f32.xlu1 %v282_v34 }
  0x74   :  { %319 = vadd.xlane.f32.xlu0 %v311_v36 }
  0x76   :  { %347 = vadd.xlane.f32.xlu1 %v340_v38 }
  0x78   :  { %306 = vadd.xlane.f32.xlu0 %v297_v43 }
  0x7a   :  { %334 = vadd.xlane.f32.xlu1 %v326_v46 }
  0x7c   :  { %128 = vadd.xlane.f32.xlu0 %v127_v48 }
  0x7e   :  { %137 = vadd.xlane.f32.xlu1 %v136_v51 }
  0x80   :  { %321 = vadd.xlane.f32.xlu0 %v312_v53 }
  0x82   :  { %349 = vadd.xlane.f32.xlu1 %v341_v54 }
  0x84   :  { %146 = vadd.xlane.f32.xlu0 %v145_v19 }
  0x86   :  { %336 = vadd.xlane.f32.xlu1 %v327_v59 }
  0x88   :  { %155 = vadd.xlane.f32.xlu0 %v154_v63 }
  0x8a   :  { %351 = vadd.xlane.f32.xlu1 %v342_v0 }
  0x8c   :  { %164 = vadd.xlane.f32.xlu0 %v163_v42 }
  0x8e   :  { %173 = vadd.xlane.f32.xlu1 %v172_v6 }
  0x90   :  { %182 = vadd.xlane.f32.xlu0 %v181_v39 }
  0x92   :  { %191 = vadd.xlane.f32.xlu1 %v190_v8 }
  0xbd   :  { %v1487_v57 = vpop.xlane.xlu0 %238 }
  0xbe   :  { %v433_v9 = vsub.f32 0.0, %v1487_v57 }
  0xbf   :  { %v1490_v11 = vpop.xlane.xlu1 %253 }
  0xc0   :  { %v513_v3 = vand.u32 2147483647, %v433_v9  ;;  %v438_v12 = vsub.f32 0.0, %v1490_v11 }
  0xc1   :  { %v1495_v13 = vpop.xlane.xlu0 %240 }
  0xc2   :  { %v553_v15 = vsub.f32 0.0, %v513_v3  ;;  %v518_v16 = vand.u32 2147483647, %v438_v12  ;;  %v434_v17 = vsub.f32 0.0, %v1495_v13 }
  0xc3   :  { %v1500_v18 = vpop.xlane.xlu1 %255 }
  0xc4   :  { %v593_v20 = vmul.f32 1.442695, %v553_v15  ;;  %v558_v21 = vsub.f32 0.0, %v518_v16  ;;  %v514_v22 = vand.u32 2147483647, %v434_v17  ;;  %v439_v23 = vsub.f32 0.0, %v1500_v18 }
  0xc5   :  { %v1505_v24 = vpop.xlane.xlu0 %242  ;;  %v474_v57 = vmin.f32 %v434_v17, 0.0 }
  0xc6   :  { %1099 = vpow2.f32 %v593_v20  ;;  %v603_v25 = vmul.f32 1.442695, %v558_v21  ;;  %v554_v26 = vsub.f32 0.0, %v514_v22  ;;  %v435_v28 = vsub.f32 0.0, %v1505_v24 }
  0xc7   :  { %v519_v29 = vand.u32 2147483647, %v439_v23  ;;  %v1510_v30 = vpop.xlane.xlu1 %270 }
  0xc8   :  { %1101 = vpow2.f32 %v603_v25  ;;  %v595_v10 = vmul.f32 1.442695, %v554_v26  ;;  %v515_v31 = vand.u32 2147483647, %v435_v28  ;;  %v444_v33 = vsub.f32 0.0, %v1510_v30 }
  0xc9   :  { %v559_v32 = vsub.f32 0.0, %v519_v29  ;;  %v1515_v34 = vpop.xlane.xlu0 %268 }
  0xca   :  { %1103 = vpow2.f32 %v595_v10  ;;  %v555_v35 = vsub.f32 0.0, %v515_v31  ;;  %v443_v36 = vsub.f32 0.0, %v1515_v34  ;;  %v524_v38 = vand.u32 2147483647, %v444_v33 }
  0xcb   :  { %v605_v37 = vmul.f32 1.442695, %v559_v32  ;;  %v1520_v40 = vpop.xlane.xlu1 %257  ;;  %v484_v18 = vmin.f32 %v444_v33, 0.0 }
  0xcc   :  { %v597_v41 = vmul.f32 1.442695, %v555_v35  ;;  %v523_v43 = vand.u32 2147483647, %v443_v36  ;;  %v440_v44 = vsub.f32 0.0, %v1520_v40  ;;  %v564_v45 = vsub.f32 0.0, %v524_v38 }
  0xcd   :  { %1105 = vpow2.f32 %v605_v37  ;;  %v1525_v46 = vpop.xlane.xlu0 %272 }
  0xce   :  { %1107 = vpow2.f32 %v597_v41  ;;  %v563_v47 = vsub.f32 0.0, %v523_v43  ;;  %v520_v48 = vand.u32 2147483647, %v440_v44  ;;  %v615_v49 = vmul.f32 1.442695, %v564_v45 }
  0xcf   :  { %v445_v50 = vsub.f32 0.0, %v1525_v46  ;;  %v1530_v51 = vpop.xlane.xlu1 %298  ;;  %v473_v41 = vmin.f32 %v433_v9, 0.0 }
  0xd0   :  { %v613_v52 = vmul.f32 1.442695, %v563_v47  ;;  %v560_v53 = vsub.f32 0.0, %v520_v48  ;;  %1109 = vpow2.f32 %v615_v49  ;;  %v453_v58 = vsub.f32 0.0, %v1530_v51 }
  0xd1   :  { %v525_v14 = vand.u32 2147483647, %v445_v50  ;;  %v1534_v54 = vpop.xlane.xlu0 %283  ;;  %v478_v47 = vmin.f32 %v438_v12, 0.0 }
  0xd2   :  { %1111 = vpow2.f32 %v613_v52  ;;  %v607_v55 = vmul.f32 1.442695, %v560_v53  ;;  %v533_v1 = vand.u32 2147483647, %v453_v58  ;;  %v448_v42 = vsub.f32 0.0, %v1534_v54 }
  0xd3   :  { %v1100_v56 = vpop.eup %1099  ;;  %v565_v19 = vsub.f32 0.0, %v525_v14  ;;  %v1537_v59 = vpop.xlane.xlu1 %285 }
  0xd4   :  { %v673_v60 = vadd.f32 1.0, %v1100_v56  ;;  %1113 = vpow2.f32 %v607_v55  ;;  %v573_v39 = vsub.f32 0.0, %v533_v1  ;;  %v449_v3 = vsub.f32 0.0, %v1537_v59 }
  0xd5   :  { %v1102_v61 = vpop.eup %1101  ;;  %v617_v62 = vmul.f32 1.442695, %v565_v19  ;;  %v1539_v27 = vpop.xlane.xlu0 %300  ;;  %v528_v20 = vand.u32 2147483647, %v448_v42  ;;  %v479_v55 = vmin.f32 %v439_v23, 0.0  ;;  %v475_v1 = vmin.f32 %v435_v28, 0.0 }
  0xd6   :  { %1115 = vlog2.f32 %v673_v60  ;;  %v678_v63 = vadd.f32 1.0, %v1102_v61  ;;  %v454_v21 = vsub.f32 0.0, %v1539_v27  ;;  %v633_v10 = vmul.f32 1.442695, %v573_v39 }
  0xd7   :  { %v1104_v0 = vpop.eup %1103  ;;  %1117 = vpow2.f32 %v617_v62  ;;  %v1543_v2 = vpop.xlane.xlu1 %244  ;;  %v529_v37 = vand.u32 2147483647, %v449_v3  ;;  %v568_v43 = vsub.f32 0.0, %v528_v20  ;;  %v483_v39 = vmin.f32 %v443_v36, 0.0 }
  0xd8   :  { %1119 = vlog2.f32 %v678_v63  ;;  %v674_v4 = vadd.f32 1.0, %v1104_v0  ;;  %v436_v25 = vsub.f32 0.0, %v1543_v2  ;;  %v534_v45 = vand.u32 2147483647, %v454_v21 }
  0xd9   :  { %v1547_v15 = vpop.xlane.xlu0 %259  ;;  %v569_v56 = vsub.f32 0.0, %v529_v37  ;;  %v623_v61 = vmul.f32 1.442695, %v568_v43 }
  0xda   :  { %v1106_v5 = vpop.eup %1105  ;;  %1121 = vlog2.f32 %v674_v4  ;;  %v441_v31 = vsub.f32 0.0, %v1547_v15  ;;  %v516_v49 = vand.u32 2147483647, %v436_v25  ;;  %v574_v62 = vsub.f32 0.0, %v534_v45 }
  0xdb   :  { %v1108_v6 = vpop.eup %1107  ;;  %v679_v7 = vadd.f32 1.0, %v1106_v5  ;;  %v1549_v16 = vpop.xlane.xlu1 %287  ;;  %v1667_v51 = vmin.f32 %v436_v25, 0.0 }
  0xdc   :  { %v675_v8 = vadd.f32 1.0, %v1108_v6  ;;  %v450_v32 = vsub.f32 0.0, %v1549_v16  ;;  %v521_v9 = vand.u32 2147483647, %v441_v31  ;;  %v556_v4 = vsub.f32 0.0, %v516_v49 }
  0xdd   :  { %1123 = vlog2.f32 %v679_v7  ;;  %v1110_v22 = vpop.eup %1109  ;;  %v1567_v52 = vpop.xlane.xlu0 %313  ;;  %v1673_v59 = vmin.f32 %v441_v31, 0.0 }
  0xde   :  { %1125 = vlog2.f32 %v675_v8  ;;  %v684_v29 = vadd.f32 1.0, %v1110_v22  ;;  %v530_v11 = vand.u32 2147483647, %v450_v32  ;;  %v458_v13 = vsub.f32 0.0, %v1567_v52 }
  0xdf   :  { %v1112_v26 = vpop.eup %1111  ;;  %v1578_v17 = vpop.xlane.xlu1 %315  ;;  %v561_v23 = vsub.f32 0.0, %v521_v9  ;;  %v625_v8 = vmul.f32 1.442695, %v569_v56  ;;  %v1677_v27 = vmin.f32 %v450_v32, 0.0 }
  0xe0   :  { %v683_v35 = vadd.f32 1.0, %v1112_v26  ;;  %1127 = vlog2.f32 %v684_v29  ;;  %v570_v6 = vsub.f32 0.0, %v530_v11  ;;  %v459_v20 = vsub.f32 0.0, %v1578_v17 }
  0xe1   :  { %v1114_v38 = vpop.eup %1113  ;;  %v635_v26 = vmul.f32 1.442695, %v574_v62  ;;  %v538_v24 = vand.u32 2147483647, %v458_v13  ;;  %v1589_v28 = vpop.xlane.xlu0 %274  ;;  %v609_v37 = vmul.f32 1.442695, %v561_v23 }
  0xe2   :  { %1129 = vlog2.f32 %v683_v35  ;;  %v680_v48 = vadd.f32 1.0, %v1114_v38  ;;  %v599_v35 = vmul.f32 1.442695, %v556_v4  ;;  %v627_v38 = vmul.f32 1.442695, %v570_v6 }
  0xe3   :  { %v1116_v53 = vpop.eup %1115  ;;  %1131 = vpow2.f32 %v633_v10  ;;  %v480_v10 = vmin.f32 %v440_v44, 0.0  ;;  %v539_v45 = vand.u32 2147483647, %v459_v20  ;;  %v578_v49 = vsub.f32 0.0, %v538_v24 }
  0xe4   :  { %v1118_v12 = vpop.eup %1117  ;;  %v714_v14 = vmul.f32 0.6931472, %v1116_v53  ;;  %1133 = vlog2.f32 %v680_v48  ;;  %v1595_v53 = vpop.xlane.xlu1 %302  ;;  %v1681_v2 = vmin.f32 %v458_v13, 0.0  ;;  %v1686_v25 = vmin.f32 %v459_v20, 0.0 }
  0xe5   :  { %v1120_v19 = vpop.eup %1119  ;;  %v685_v60 = vadd.f32 1.0, %v1118_v12  ;;  %v579_v62 = vsub.f32 0.0, %v539_v45 }
  0xe6   :  { %v793_v63 = vsub.f32 %v473_v41, %v714_v14  ;;  %v724_v0 = vmul.f32 0.6931472, %v1120_v19  ;;  %v1599_v19 = vpop.xlane.xlu0 %328 }
  0xe7   :  { %v1122_v5 = vpop.eup %1121  ;;  %1135 = vlog2.f32 %v685_v60 }
  0xe8   :  { %v716_v7 = vmul.f32 0.6931472, %v1122_v5  ;;  %v798_v22 = vsub.f32 %v478_v47, %v724_v0  ;;  %1137 = vpow2.f32 %v623_v61  ;;  %v833_v33 = vmax.f32 %v793_v63, -20.723267  ;;  %v1606_v24 = vpop.xlane.xlu1 %330 }
  0xe9   :  { %1139 = vpow2.f32 %v625_v8 }
  0xea   :  { %v1124_v30 = vpop.eup %1123  ;;  %v794_v29 = vsub.f32 %v474_v57, %v716_v7  ;;  %v838_v47 = vmax.f32 %v798_v22, -20.723267  ;;  %1141 = vpow2.f32 %v635_v26  ;;  %v931_v40 = vsel %vm930_vm1, %v833_v33, 0.0 }
  0xeb   :  { %v1126_v34 = vpop.eup %1125  ;;  %v726_v36 = vmul.f32 0.6931472, %v1124_v30  ;;  %1143 = vpow2.f32 %v599_v35  ;;  %v645_v35 = vmul.f32 1.442695, %v579_v62 }
  0xec   :  { %v834_v41 = vmax.f32 %v794_v29, -20.723267  ;;  %v718_v43 = vmul.f32 0.6931472, %v1126_v34  ;;  %1145 = vpow2.f32 %v609_v37  ;;  %v946_v0 = vsel %vm930_vm1, %v838_v47, 0.0 }
  0xed   :  { %v799_v48 = vsub.f32 %v479_v55, %v726_v36  ;;  %v1128_v57 = vpop.eup %1127  ;;  %1147 = vpow2.f32 %v627_v38  ;;  %v446_v34 = vsub.f32 0.0, %v1589_v28  ;;  %v1611_v38 = vpop.xlane.xlu0 %246 }
  0xee   :  { %v932_v44 = vsel %vm930_vm1, %v834_v41, 0.0  ;;  %v795_v9 = vsub.f32 %v475_v1, %v718_v43  ;;  %v736_v56 = vmul.f32 0.6931472, %v1128_v57  ;;  %v643_v1 = vmul.f32 1.442695, %v578_v49 }
  0xef   :  { %v1130_v11 = vpop.eup %1129  ;;  %v933_v12 = vadd.f32 %v932_v44, %v931_v40  ;;  %v839_v14 = vmax.f32 %v799_v48, -20.723267  ;;  %v526_v46 = vand.u32 2147483647, %v446_v34  ;;  %v1691_v16 = vmin.f32 %v446_v34, 0.0 }
  0xf0   :  { %v1132_v60 = vpop.eup %1131  ;;  %v835_v55 = vmax.f32 %v795_v9, -20.723267  ;;  %v734_v61 = vmul.f32 0.6931472, %v1130_v11  ;;  %v804_v5 = vsub.f32 %v484_v18, %v736_v56  ;;  %v485_v18 = vmin.f32 %v445_v50, 0.0  ;;  %v1621_v9 = vpop.xlane.xlu1 %261 }
  0xf1   :  { %v1134_v63 = vpop.eup %1133  ;;  %v947_v4 = vsel %vm930_vm1, %v839_v14, 0.0  ;;  %v693_v37 = vadd.f32 1.0, %v1132_v60  ;;  %1149 = vpow2.f32 %v643_v1  ;;  %v455_v50 = vsub.f32 0.0, %v1595_v53  ;;  %v1625_v60 = vpop.xlane.xlu0 %289 }
  0xf2   :  { %v948_v23 = vadd.f32 %v947_v4, %v946_v0  ;;  %v934_v6 = vsel %vm930_vm1, %v835_v55, 0.0  ;;  %v803_v7 = vsub.f32 %v483_v39, %v734_v61  ;;  %v728_v8 = vmul.f32 0.6931472, %v1134_v63 }
  0xf3   :  { %v1604_v22 = vadd.f32 %v934_v6, %v933_v12  ;;  %v844_v26 = vmax.f32 %v804_v5, -20.723267  ;;  %1151 = vpow2.f32 %v645_v35  ;;  %v437_v56 = vsub.f32 0.0, %v1611_v38 }
  0xf4   :  { %v1136_v30 = vpop.eup %1135  ;;  %v843_v33 = vmax.f32 %v803_v7, -20.723267  ;;  %v800_v29 = vsub.f32 %v480_v10, %v728_v8  ;;  %1153 = vlog2.f32 %v693_v37  ;;  %v566_v63 = vsub.f32 0.0, %v526_v46  ;;  %v1634_v8 = vpop.xlane.xlu1 %317 }
  0xf5   :  { %v738_v36 = vmul.f32 0.6931472, %v1136_v30  ;;  %v1138_v39 = vpop.eup %1137  ;;  %v962_v41 = vsel %vm930_vm1, %v844_v26, 0.0  ;;  %v535_v0 = vand.u32 2147483647, %v455_v50  ;;  %v442_v1 = vsub.f32 0.0, %v1621_v9 }
  0xf6   :  { %v961_v43 = vsel %vm930_vm1, %v843_v33, 0.0  ;;  %v840_v45 = vmax.f32 %v800_v29, -20.723267  ;;  %v1140_v49 = vpop.eup %1139  ;;  %v688_v44 = vadd.f32 1.0, %v1138_v39  ;;  %v517_v6 = vand.u32 2147483647, %v437_v56 }
  0xf7   :  { %v963_v47 = vadd.f32 %v962_v41, %v961_v43  ;;  %v805_v48 = vsub.f32 %v485_v18, %v738_v36  ;;  %v1142_v11 = vpop.eup %1141  ;;  %v689_v62 = vadd.f32 1.0, %v1140_v49  ;;  %v619_v26 = vmul.f32 1.442695, %v566_v63  ;;  %v1639_v18 = vpop.xlane.xlu0 %343 }
  0xf8   :  { %v949_v10 = vsel %vm930_vm1, %v840_v45, 0.0  ;;  %v1144_v12 = vpop.eup %1143  ;;  %1155 = vlog2.f32 %v688_v44  ;;  %v694_v5 = vadd.f32 1.0, %v1142_v11  ;;  %v575_v30 = vsub.f32 0.0, %v535_v0 }
  0xf9   :  { %v1619_v57 = vadd.f32 %v949_v10, %v948_v23  ;;  %v845_v40 = vmax.f32 %v805_v48, -20.723267  ;;  %v1146_v55 = vpop.eup %1145  ;;  %v676_v23 = vadd.f32 1.0, %v1144_v12  ;;  %1157 = vlog2.f32 %v689_v62 }
  0xfa   :  { %v1148_v4 = vpop.eup %1147  ;;  %v681_v7 = vadd.f32 1.0, %v1146_v55  ;;  %v557_v33 = vsub.f32 0.0, %v517_v6  ;;  %1159 = vlog2.f32 %v694_v5  ;;  %v463_v29 = vsub.f32 0.0, %v1599_v19  ;;  %v1642_v19 = vpop.xlane.xlu1 %345 }
  0xfb   :  { %v964_v14 = vsel %vm930_vm1, %v845_v40, 0.0  ;;  %v522_v35 = vand.u32 2147483647, %v442_v1  ;;  %1161 = vlog2.f32 %v676_v23  ;;  %v690_v37 = vadd.f32 1.0, %v1148_v4  ;;  %v1647_v44 = vpop.xlane.xlu0 %276 }
  0xfc   :  { %v1627_v61 = vadd.f32 %v964_v14, %v963_v47  ;;  %v601_v39 = vmul.f32 1.442695, %v557_v33  ;;  %1163 = vlog2.f32 %v681_v7  ;;  %v464_v41 = vsub.f32 0.0, %v1606_v24 }
  0xfd   :  { %1165 = vpow2.f32 %v619_v26  ;;  %v637_v43 = vmul.f32 1.442695, %v575_v30  ;;  %v543_v48 = vand.u32 2147483647, %v463_v29  ;;  %v562_v10 = vsub.f32 0.0, %v522_v35 }
  0xfe   :  { %v1150_v36 = vpop.eup %1149  ;;  %1167 = vpow2.f32 %v601_v39  ;;  %v544_v49 = vand.u32 2147483647, %v464_v41  ;;  %v451_v40 = vsub.f32 0.0, %v1625_v60  ;;  %v493_v63 = vmin.f32 %v453_v58, 0.0  ;;  %v1655_v23 = vpop.xlane.xlu1 %304 }
  0xff   :  { %v698_v47 = vadd.f32 1.0, %v1150_v36  ;;  %1169 = vlog2.f32 %v690_v37  ;;  %v583_v14 = vsub.f32 0.0, %v543_v48  ;;  %v611_v55 = vmul.f32 1.442695, %v562_v10  ;;  %v1669_v30 = vpop.xlane.xlu0 %332 }
 0x100   :  { %v1152_v45 = vpop.eup %1151  ;;  %1171 = vpow2.f32 %v637_v43  ;;  %v488_v0 = vmin.f32 %v448_v42, 0.0  ;;  %v584_v4 = vsub.f32 0.0, %v544_v49  ;;  %v531_v5 = vand.u32 2147483647, %v451_v40 }
 0x101   :  { %v1154_v46 = vpop.eup %1153  ;;  %v699_v11 = vadd.f32 1.0, %v1152_v45  ;;  %1173 = vlog2.f32 %v698_v47  ;;  %v1659_v6 = vmin.f32 %v449_v3, 0.0  ;;  %v1663_v7 = vmin.f32 %v454_v21, 0.0 }
 0x102   :  { %v754_v12 = vmul.f32 0.6931472, %v1154_v46  ;;  %v653_v26 = vmul.f32 1.442695, %v583_v14  ;;  %v460_v3 = vsub.f32 0.0, %v1634_v8  ;;  %v571_v36 = vsub.f32 0.0, %v531_v5  ;;  %v1700_v43 = vpop.xlane.xlu1 %291 }
 0x103   :  { %1175 = vlog2.f32 %v699_v11  ;;  %v655_v35 = vmul.f32 1.442695, %v584_v4  ;;  %v468_v15 = vsub.f32 0.0, %v1639_v18  ;;  %v1695_v32 = vmin.f32 %v455_v50, 0.0  ;;  %v1706_v10 = vpop.xlane.xlu0 %319 }
 0x104   :  { %v813_v58 = vsub.f32 %v493_v63, %v754_v12  ;;  %1177 = vpow2.f32 %v611_v55  ;;  %v1697_v52 = vmin.f32 %v463_v29, 0.0  ;;  %v447_v13 = vsub.f32 0.0, %v1647_v44 }
 0x105   :  { %v1156_v62 = vpop.eup %1155  ;;  %1179 = vpow2.f32 %v653_v26  ;;  %v540_v34 = vand.u32 2147483647, %v460_v3  ;;  %v629_v29 = vmul.f32 1.442695, %v571_v36  ;;  %v548_v48 = vand.u32 2147483647, %v468_v15 }
 0x106   :  { %v1158_v54 = vpop.eup %1157  ;;  %v744_v42 = vmul.f32 0.6931472, %v1156_v62  ;;  %v853_v20 = vmax.f32 %v813_v58, -20.723267  ;;  %1181 = vpow2.f32 %v655_v35  ;;  %v1710_v49 = vmin.f32 %v464_v41, 0.0 }
 0x107   :  { %v1160_v33 = vpop.eup %1159  ;;  %v746_v39 = vmul.f32 0.6931472, %v1158_v54  ;;  %v469_v11 = vsub.f32 0.0, %v1642_v19  ;;  %v527_v12 = vand.u32 2147483647, %v447_v13  ;;  %v1722_v24 = vmin.f32 %v437_v56, 0.0 }
 0x108   :  { %v1162_v21 = vpop.eup %1161  ;;  %v808_v37 = vsub.f32 %v488_v0, %v744_v42  ;;  %v756_v47 = vmul.f32 0.6931472, %v1160_v33  ;;  %v1716_v55 = vsel %vm930_vm1, %v853_v20, 0.0  ;;  %v580_v41 = vsub.f32 0.0, %v540_v34  ;;  %v1726_v33 = vpop.xlane.xlu1 %347 }
 0x109   :  { %v1164_v31 = vpop.eup %1163  ;;  %v720_v28 = vmul.f32 0.6931472, %v1162_v21  ;;  %v809_v63 = vsub.f32 %v1659_v6, %v746_v39  ;;  %1183 = vpow2.f32 %v629_v29  ;;  %v588_v26 = vsub.f32 0.0, %v548_v48 }
 0x10a   :  { %v1166_v17 = vpop.eup %1165  ;;  %v730_v50 = vmul.f32 0.6931472, %v1164_v31  ;;  %v848_v62 = vmax.f32 %v808_v37, -20.723267  ;;  %v814_v5 = vsub.f32 %v1663_v7, %v756_v47  ;;  %v549_v21 = vand.u32 2147483647, %v469_v11  ;;  %v1731_v31 = vpop.xlane.xlu0 %306 }
 0x10b   :  { %v1168_v45 = vpop.eup %1167  ;;  %v686_v46 = vadd.f32 1.0, %v1166_v17  ;;  %v796_v58 = vsub.f32 %v1667_v51, %v720_v28  ;;  %v567_v7 = vsub.f32 0.0, %v527_v12  ;;  %v849_v56 = vmax.f32 %v809_v63, -20.723267 }
 0x10c   :  { %v1170_v53 = vpop.eup %1169  ;;  %v677_v0 = vadd.f32 1.0, %v1168_v45  ;;  %v801_v42 = vsub.f32 %v1673_v59, %v730_v50  ;;  %v976_v38 = vsel %vm930_vm1, %v848_v62, 0.0  ;;  %v854_v59 = vmax.f32 %v814_v5, -20.723267 }
 0x10d   :  { %v1172_v14 = vpop.eup %1171  ;;  %v748_v54 = vmul.f32 0.6931472, %v1170_v53  ;;  %1185 = vlog2.f32 %v686_v46  ;;  %v647_v20 = vmul.f32 1.442695, %v580_v41  ;;  %v456_v37 = vsub.f32 0.0, %v1655_v23 }
 0x10e   :  { %v1174_v4 = vpop.eup %1173  ;;  %v695_v6 = vadd.f32 1.0, %v1172_v14  ;;  %1187 = vlog2.f32 %v677_v0  ;;  %v836_v39 = vmax.f32 %v796_v58, -20.723267  ;;  %v841_v45 = vmax.f32 %v801_v42, -20.723267 }
 0x10f   :  { %v764_v36 = vmul.f32 0.6931472, %v1174_v4  ;;  %v810_v17 = vsub.f32 %v1677_v27, %v748_v54  ;;  %v663_v47 = vmul.f32 1.442695, %v588_v26  ;;  %v589_v34 = vsub.f32 0.0, %v549_v21  ;;  %v1741_v27 = vpop.xlane.xlu1 %334 }
 0x110   :  { %v1176_v35 = vpop.eup %1175  ;;  %1189 = vlog2.f32 %v695_v6  ;;  %v621_v53 = vmul.f32 1.442695, %v567_v7  ;;  %v977_v50 = vsel %vm930_vm1, %v849_v56, 0.0  ;;  %v1739_v48 = vmin.f32 %v442_v1, 0.0  ;;  %v1752_v1 = vpop.xlane.xlu0 %128 }
 0x111   :  { %v1178_v51 = vpop.eup %1177  ;;  %v766_v28 = vmul.f32 0.6931472, %v1176_v35  ;;  %v818_v29 = vsub.f32 %v1681_v2, %v764_v36  ;;  %v850_v14 = vmax.f32 %v810_v17, -20.723267  ;;  %v1745_v62 = vmin.f32 %v451_v40, 0.0 }
 0x112   :  { %v682_v46 = vadd.f32 1.0, %v1178_v51  ;;  %v1180_v12 = vpop.eup %1179  ;;  %1191 = vpow2.f32 %v647_v20  ;;  %v536_v63 = vand.u32 2147483647, %v456_v37  ;;  %v992_v0 = vsel %vm930_vm1, %v854_v59, 0.0 }
 0x113   :  { %v936_v2 = vsel %vm930_vm1, %v836_v39, 0.0  ;;  %v951_v9 = vsel %vm930_vm1, %v841_v45, 0.0  ;;  %1193 = vpow2.f32 %v663_v47  ;;  %v1182_v4 = vpop.eup %1181  ;;  %v819_v5 = vsub.f32 %v1686_v25, %v766_v28  ;;  %v1769_v36 = vpop.xlane.xlu1 %137 }
 0x114   :  { %v665_v54 = vmul.f32 1.442695, %v589_v34  ;;  %1195 = vpow2.f32 %v621_v53  ;;  %v465_v60 = vsub.f32 0.0, %v1669_v30  ;;  %v858_v40 = vmax.f32 %v818_v29, -20.723267 }
 0x115   :  { %v703_v41 = vadd.f32 1.0, %v1180_v12  ;;  %1197 = vlog2.f32 %v682_v46  ;;  %v452_v58 = vsub.f32 0.0, %v1700_v43  ;;  %v978_v42 = vadd.f32 %v977_v50, %v976_v38 }
 0x116   :  { %v979_v26 = vsel %vm930_vm1, %v850_v14, 0.0  ;;  %v576_v6 = vsub.f32 0.0, %v536_v63  ;;  %v361_v21 = vand.u32 2147483647, %v1752_v1  ;;  %v1760_v7 = vadd.f32 %v992_v0, %v1716_v55  ;;  %v1184_v51 = vpop.eup %1183  ;;  %v1789_v14 = vpop.xlane.xlu0 %321 }
 0x117   :  { %v1763_v25 = vadd.f32 %v936_v2, %v1604_v22  ;;  %v704_v35 = vadd.f32 1.0, %v1182_v4  ;;  %v1767_v56 = vmin.f32 %v460_v3, 0.0  ;;  %v1772_v38 = vadd.f32 %v951_v9, %v1619_v57 }
 0x118   :  { %v859_v59 = vmax.f32 %v819_v5, -20.723267  ;;  %1199 = vpow2.f32 %v665_v54  ;;  %v545_v55 = vand.u32 2147483647, %v465_v60  ;;  %v1776_v20 = vadd.f32 %v979_v26, %v978_v42 }
 0x119   :  { %v1006_v22 = vsel %vm930_vm1, %v858_v40, 0.0  ;;  %1201 = vlog2.f32 %v703_v41  ;;  %v532_v8 = vand.u32 2147483647, %v452_v58  ;;  %v639_v39 = vmul.f32 1.442695, %v576_v6 }
 0x11a   :  { %v1186_v17 = vpop.eup %1185  ;;  %v461_v45 = vsub.f32 0.0, %v1706_v10  ;;  %v369_v57 = vsub.f32 0.0, %v361_v21  ;;  %v362_v47 = vand.u32 2147483647, %v1769_v36  ;;  %1203 = vlog2.f32 %v704_v35 }
 0x11b   :  { %v1188_v3 = vpop.eup %1187  ;;  %v691_v28 = vadd.f32 1.0, %v1184_v51  ;;  %v1785_v34 = vmin.f32 %v468_v15, 0.0  ;;  %v470_v53 = vsub.f32 0.0, %v1726_v33  ;;  %v1007_v50 = vsel %vm930_vm1, %v859_v59, 0.0 }
 0x11c   :  { %v585_v29 = vsub.f32 0.0, %v545_v55  ;;  %v377_v46 = vmul.f32 1.442695, %v369_v57  ;;  %v370_v12 = vsub.f32 0.0, %v362_v47  ;;  %v740_v0 = vmul.f32 0.6931472, %v1186_v17 }
 0x11d   :  { %v1190_v63 = vpop.eup %1189  ;;  %v722_v2 = vmul.f32 0.6931472, %v1188_v3  ;;  %v572_v9 = vsub.f32 0.0, %v532_v8  ;;  %v457_v4 = vsub.f32 0.0, %v1731_v31  ;;  %1205 = vpow2.f32 %v639_v39 }
 0x11e   :  { %v541_v18 = vand.u32 2147483647, %v461_v45  ;;  %v466_v15 = vsub.f32 0.0, %v1741_v27  ;;  %v379_v5 = vmul.f32 1.442695, %v370_v12  ;;  %v1795_v40 = vadd.f32 %v1007_v50, %v1006_v22  ;;  %v1807_v22 = vpop.xlane.xlu1 %349 }
 0x11f   :  { %v1192_v54 = vpop.eup %1191  ;;  %1207 = vlog2.f32 %v691_v28  ;;  %v550_v41 = vand.u32 2147483647, %v470_v53  ;;  %v462_v42 = vsub.f32 0.0, %v1789_v14  ;;  %v758_v6 = vmul.f32 0.6931472, %v1190_v63 }
 0x120   :  { %v1194_v26 = vpop.eup %1193  ;;  %v1802_v21 = vmin.f32 %v469_v11, 0.0  ;;  %v657_v35 = vmul.f32 1.442695, %v585_v29  ;;  %1209 = vpow2.f32 %v377_v46  ;;  %v797_v59 = vsub.f32 %v1722_v24, %v722_v2 }
 0x121   :  { %v1196_v51 = vpop.eup %1195  ;;  %v631_v55 = vmul.f32 1.442695, %v572_v9  ;;  %v537_v17 = vand.u32 2147483647, %v457_v4  ;;  %1211 = vpow2.f32 %v379_v5  ;;  %v806_v3 = vsub.f32 %v1691_v16, %v740_v0 }
 0x122   :  { %v1198_v8 = vpop.eup %1197  ;;  %v700_v39 = vadd.f32 1.0, %v1192_v54  ;;  %v581_v57 = vsub.f32 0.0, %v541_v18  ;;  %v546_v19 = vand.u32 2147483647, %v466_v15  ;;  %v708_v11 = vadd.f32 1.0, %v1194_v26  ;;  %v1820_v18 = vpop.xlane.xlu0 %146 }
 0x123   :  { %v1814_v47 = vmin.f32 %v447_v13, 0.0  ;;  %v590_v24 = vsub.f32 0.0, %v550_v41  ;;  %v542_v28 = vand.u32 2147483647, %v462_v42  ;;  %v815_v50 = vsub.f32 %v1695_v32, %v758_v6 }
 0x124   :  { %v687_v29 = vadd.f32 1.0, %v1196_v51  ;;  %1213 = vpow2.f32 %v657_v35  ;;  %v471_v16 = vsub.f32 0.0, %v1807_v22  ;;  %v837_v12 = vmax.f32 %v797_v59, -20.723267 }
 0x125   :  { %v1200_v46 = vpop.eup %1199  ;;  %v732_v63 = vmul.f32 0.6931472, %v1198_v8  ;;  %1215 = vpow2.f32 %v631_v55  ;;  %v577_v0 = vsub.f32 0.0, %v537_v17  ;;  %v846_v9 = vmax.f32 %v806_v3, -20.723267 }
 0x126   :  { %v1202_v2 = vpop.eup %1201  ;;  %1217 = vlog2.f32 %v700_v39  ;;  %v649_v44 = vmul.f32 1.442695, %v581_v57  ;;  %v586_v13 = vsub.f32 0.0, %v546_v19  ;;  %v1824_v32 = vmin.f32 %v456_v37, 0.0 }
 0x127   :  { %1219 = vlog2.f32 %v708_v11  ;;  %v667_v5 = vmul.f32 1.442695, %v590_v24  ;;  %v582_v54 = vsub.f32 0.0, %v542_v28  ;;  %v1204_v41 = vpop.eup %1203  ;;  %v855_v26 = vmax.f32 %v815_v50, -20.723267 }
 0x128   :  { %v709_v6 = vadd.f32 1.0, %v1200_v46  ;;  %1221 = vlog2.f32 %v687_v29  ;;  %v551_v35 = vand.u32 2147483647, %v471_v16  ;;  %v938_v51 = vsel %vm930_vm1, %v837_v12, 0.0 }
 0x129   :  { %v802_v59 = vsub.f32 %v1739_v48, %v732_v63  ;;  %v641_v55 = vmul.f32 1.442695, %v577_v0  ;;  %v363_v17 = vand.u32 2147483647, %v1820_v18  ;;  %v966_v23 = vsel %vm930_vm1, %v846_v9, 0.0  ;;  %v1841_v63 = vpop.xlane.xlu1 %336 }
 0x12a   :  { %v774_v37 = vmul.f32 0.6931472, %v1202_v2  ;;  %1223 = vpow2.f32 %v649_v44  ;;  %v659_v8 = vmul.f32 1.442695, %v586_v13  ;;  %v1206_v3 = vpop.eup %1205  ;;  %v776_v39 = vmul.f32 0.6931472, %v1204_v41 }
 0x12b   :  { %v1834_v57 = vmin.f32 %v465_v60, 0.0  ;;  %1225 = vpow2.f32 %v667_v5  ;;  %v651_v19 = vmul.f32 1.442695, %v582_v54  ;;  %v994_v24 = vsel %vm930_vm1, %v855_v26, 0.0 }
 0x12c   :  { %v1208_v11 = vpop.eup %1207  ;;  %v939_v48 = vadd.f32 %v938_v51, %v1763_v25  ;;  %1227 = vlog2.f32 %v709_v6  ;;  %v591_v28 = vsub.f32 0.0, %v551_v35  ;;  %v1839_v29 = vadd.f32 %v966_v23, %v1627_v61  ;;  %v1858_v51 = vpop.xlane.xlu0 %155 }
 0x12d   :  { %v1210_v50 = vpop.eup %1209  ;;  %v842_v46 = vmax.f32 %v802_v59, -20.723267  ;;  %1229 = vpow2.f32 %v641_v55  ;;  %v371_v12 = vsub.f32 0.0, %v363_v17  ;;  %v823_v60 = vsub.f32 %v1697_v52, %v774_v37  ;;  %v1865_v37 = vpop.xlane.xlu1 %351 }
 0x12e   :  { %v1212_v30 = vpop.eup %1211  ;;  %v696_v0 = vadd.f32 1.0, %v1206_v3  ;;  %1231 = vpow2.f32 %v659_v8  ;;  %v393_v2 = vadd.f32 1.0, %v1210_v50  ;;  %v1845_v9 = vadd.f32 %v994_v24, %v1760_v7 }
 0x12f   :  { %v824_v25 = vsub.f32 %v1710_v49, %v776_v39  ;;  %v394_v44 = vadd.f32 1.0, %v1212_v30  ;;  %1233 = vpow2.f32 %v651_v19  ;;  %v940_v61 = vrot.slane %v939_v48, 4 }
 0x130   :  { %v750_v13 = vmul.f32 0.6931472, %v1208_v11  ;;  %1235 = vlog2.f32 %v393_v2  ;;  %v669_v5 = vmul.f32 1.442695, %v591_v28  ;;  %v953_v41 = vsel %vm930_vm1, %v842_v46, 0.0 }
 0x131   :  { %v1214_v54 = vpop.eup %1213  ;;  %1237 = vlog2.f32 %v394_v44  ;;  %v381_v26 = vmul.f32 1.442695, %v371_v12  ;;  %v467_v52 = vsub.f32 0.0, %v1841_v63  ;;  %v863_v35 = vmax.f32 %v823_v60, -20.723267 }
 0x132   :  { %v1216_v6 = vpop.eup %1215  ;;  %1239 = vlog2.f32 %v696_v0  ;;  %v1852_v7 = vmin.f32 %v452_v58, 0.0  ;;  %v1856_v49 = vmin.f32 %v461_v45, 0.0  ;;  %v864_v55 = vmax.f32 %v824_v25, -20.723267 }
 0x133   :  { %v1218_v59 = vpop.eup %1217  ;;  %v1862_v17 = vmin.f32 %v470_v53, 0.0  ;;  %v353_v23 = vmin.f32 %v1752_v1, 0.0  ;;  %1241 = vpow2.f32 %v381_v26  ;;  %v941_v58 = vadd.f32 %v940_v61, %v939_v48 }
 0x134   :  { %v1220_v43 = vpop.eup %1219  ;;  %v954_v8 = vadd.f32 %v953_v41, %v1772_v38  ;;  %1243 = vpow2.f32 %v669_v5  ;;  %v547_v10 = vand.u32 2147483647, %v467_v52  ;;  %v811_v3 = vsub.f32 %v1745_v62, %v750_v13 }
 0x135   :  { %v1222_v45 = vpop.eup %1221  ;;  %v705_v39 = vadd.f32 1.0, %v1214_v54  ;;  %v1873_v33 = vmin.f32 %v457_v4, 0.0  ;;  %v364_v53 = vand.u32 2147483647, %v1858_v51  ;;  %v1021_v19 = vsel %vm930_vm1, %v863_v35, 0.0 }
 0x136   :  { %v768_v11 = vmul.f32 0.6931472, %v1218_v59  ;;  %v587_v24 = vsub.f32 0.0, %v547_v10  ;;  %v472_v38 = vsub.f32 0.0, %v1865_v37  ;;  %v1022_v28 = vsel %vm930_vm1, %v864_v55, 0.0 }
 0x137   :  { %v1224_v48 = vpop.eup %1223  ;;  %v692_v50 = vadd.f32 1.0, %v1216_v6  ;;  %v1881_v62 = vmin.f32 %v466_v15, 0.0  ;;  %v372_v46 = vsub.f32 0.0, %v364_v53  ;;  %v942_v4 = vrot.slane %v941_v58, 2 }
 0x138   :  { %v1226_v31 = vpop.eup %1225  ;;  %v955_v12 = vrot.slane %v954_v8, 4  ;;  %v742_v30 = vmul.f32 0.6931472, %v1222_v45  ;;  %v661_v60 = vmul.f32 1.442695, %v587_v24  ;;  %1245 = vlog2.f32 %v705_v39 }
 0x139   :  { %v1228_v0 = vpop.eup %1227  ;;  %v851_v2 = vmax.f32 %v811_v3, -20.723267  ;;  %v383_v25 = vmul.f32 1.442695, %v372_v46  ;;  %v552_v44 = vand.u32 2147483647, %v472_v38  ;;  %v820_v13 = vsub.f32 %v1767_v56, %v768_v11 }
 0x13a   :  { %v1230_v61 = vpop.eup %1229  ;;  %v784_v27 = vmul.f32 0.6931472, %v1220_v43  ;;  %v354_v15 = vmin.f32 %v1769_v36, 0.0  ;;  %1247 = vpow2.f32 %v661_v60  ;;  %v1887_v54 = vadd.f32 %v1022_v28, %v1021_v19 }
 0x13b   :  { %v1232_v5 = vpop.eup %1231  ;;  %v701_v41 = vadd.f32 1.0, %v1224_v48  ;;  %v1891_v26 = vmin.f32 %v462_v42, 0.0  ;;  %1249 = vpow2.f32 %v383_v25  ;;  %v1893_v35 = vadd.f32 %v942_v4, %v941_v58 }
 0x13c   :  { %v1234_v6 = vpop.eup %1233  ;;  %v807_v59 = vsub.f32 %v1814_v47, %v742_v30  ;;  %v1898_v56 = vmin.f32 %v471_v16, 0.0  ;;  %v355_v36 = vmin.f32 %v1820_v18, 0.0  ;;  %v956_v43 = vadd.f32 %v955_v12, %v954_v8 }
 0x13d   :  { %v1236_v55 = vpop.eup %1235  ;;  %v1902_v10 = vsel %vm930_vm1, %v851_v2, 0.0  ;;  %1251 = vlog2.f32 %v692_v50  ;;  %v592_v14 = vsub.f32 0.0, %v552_v44  ;;  %v860_v45 = vmax.f32 %v820_v13, -20.723267 }
 0x13e   :  { %v1238_v42 = vpop.eup %1237  ;;  %v828_v58 = vsub.f32 %v1785_v34, %v784_v27  ;;  %v697_v3 = vadd.f32 1.0, %v1230_v61  ;;  %v402_v39 = vmul.f32 0.6931472, %v1236_v55  ;;  %1253 = vlog2.f32 %v701_v41  ;;  %v1908_v34 = vpop.xlane.xlu0 %164 }
 0x13f   :  { %v1240_v47 = vpop.eup %1239  ;;  %v404_v22 = vmul.f32 0.6931472, %v1238_v42  ;;  %v702_v16 = vadd.f32 1.0, %v1234_v6  ;;  %v671_v53 = vmul.f32 1.442695, %v592_v14  ;;  %v944_v11 = vrot.slane %v1893_v35, 1  ;;  %v1916_v61 = vpop.xlane.xlu1 %173 }
 0x140   :  { %v1242_v19 = vpop.eup %1241  ;;  %v847_v8 = vmax.f32 %v807_v59, -20.723267  ;;  %v710_v24 = vadd.f32 1.0, %v1226_v31  ;;  %v417_v48 = vsub.f32 %v353_v23, %v402_v39  ;;  %v957_v50 = vrot.slane %v956_v43, 2 }
 0x141   :  { %v1244_v28 = vpop.eup %1243  ;;  %v418_v46 = vsub.f32 %v354_v15, %v404_v22  ;;  %v395_v4 = vadd.f32 1.0, %v1242_v19  ;;  %1255 = vpow2.f32 %v671_v53  ;;  %v1910_v12 = vmax.f32 %v828_v58, -20.723267 }
 0x142   :  { %1257 = vlog2.f32 %v697_v3  ;;  %v706_v30 = vadd.f32 1.0, %v1232_v5  ;;  %v425_v60 = vmax.f32 %v417_v48, -20.723267  ;;  %v1912_v2 = vmul.f32 0.6931472, %v1228_v0  ;;  %v1925_v3 = vpop.xlane.xlu0 %182 }
 0x143   :  { %v760_v25 = vmul.f32 0.6931472, %v1240_v47  ;;  %v426_v44 = vmax.f32 %v418_v46, -20.723267  ;;  %1259 = vlog2.f32 %v702_v16  ;;  %v968_v1 = vsel %vm930_vm1, %v847_v8, 0.0 }
 0x144   :  { %v874_v23 = vsel %vm873_vm2, %v425_v60, 0.0  ;;  %v711_v31 = vadd.f32 1.0, %v1244_v28  ;;  %1261 = vlog2.f32 %v395_v4  ;;  %v365_v15 = vand.u32 2147483647, %v1908_v34 }
 0x145   :  { %1263 = vlog2.f32 %v710_v24  ;;  %v875_v13 = vrot.slane %v874_v23, 4  ;;  %v881_v27 = vsel %vm873_vm2, %v426_v44, 0.0  ;;  %v1246_v5 = vpop.eup %1245  ;;  %v958_v0 = vadd.f32 %v957_v50, %v956_v43 }
 0x146   :  { %v1921_v41 = vsel %vm930_vm1, %v860_v45, 0.0  ;;  %1265 = vlog2.f32 %v706_v30  ;;  %v882_v6 = vrot.slane %v881_v27, 4  ;;  %v969_v55 = vadd.f32 %v968_v1, %v1839_v29 }
 0x147   :  { %v1248_v59 = vpop.eup %1247  ;;  %v876_v14 = vadd.f32 %v875_v13, %v874_v23  ;;  %v373_v42 = vsub.f32 0.0, %v365_v15  ;;  %v366_v58 = vand.u32 2147483647, %v1916_v61  ;;  %v816_v47 = vsub.f32 %v1824_v32, %v760_v25  ;;  %v1929_v25 = vpop.xlane.xlu1 %191 }
 0x148   :  { %v1250_v39 = vpop.eup %1249  ;;  %v883_v22 = vadd.f32 %v882_v6, %v881_v27  ;;  %1267 = vlog2.f32 %v711_v31  ;;  %v707_v43 = vadd.f32 1.0, %v1248_v59  ;;  %v778_v24 = vmul.f32 0.6931472, %v1246_v5 }
 0x149   :  { %v877_v16 = vrot.slane %v876_v14, 2  ;;  %v396_v45 = vadd.f32 1.0, %v1250_v39  ;;  %v385_v53 = vmul.f32 1.442695, %v373_v42  ;;  %v374_v19 = vsub.f32 0.0, %v366_v58 }
 0x14a   :  { %v1252_v8 = vpop.eup %1251  ;;  %v884_v29 = vrot.slane %v883_v22, 2  ;;  %1269 = vlog2.f32 %v707_v43  ;;  %v367_v48 = vand.u32 2147483647, %v1925_v3  ;;  %v970_v28 = vrot.slane %v969_v55, 4 }
 0x14b   :  { %v878_v50 = vadd.f32 %v877_v16, %v876_v14  ;;  %1271 = vlog2.f32 %v396_v45  ;;  %v387_v46 = vmul.f32 1.442695, %v374_v19  ;;  %v1254_v4 = vpop.eup %1253  ;;  %v959_v32 = vrot.slane %v958_v0, 1 }
 0x14c   :  { %v885_v30 = vadd.f32 %v884_v29, %v883_v22  ;;  %1273 = vpow2.f32 %v385_v53  ;;  %v375_v60 = vsub.f32 0.0, %v367_v48  ;;  %v856_v44 = vmax.f32 %v816_v47, -20.723267 }
 0x14d   :  { %v752_v1 = vmul.f32 0.6931472, %v1252_v8  ;;  %v879_v23 = vrot.slane %v878_v50, 1  ;;  %1275 = vpow2.f32 %v387_v46  ;;  %v945_v13 = vadd.f32 %v944_v11, %v1893_v35 }
 0x14e   :  { %v1256_v31 = vpop.eup %1255  ;;  %v825_v27 = vsub.f32 %v1834_v57, %v778_v24  ;;  %v886_v15 = vrot.slane %v885_v30, 1  ;;  %v389_v5 = vmul.f32 1.442695, %v375_v60  ;;  %v971_v59 = vadd.f32 %v970_v28, %v969_v55 }
 0x14f   :  { %v1258_v6 = vpop.eup %1257  ;;  %v880_v14 = vadd.f32 %v879_v23, %v878_v50  ;;  %v712_v42 = vadd.f32 1.0, %v1256_v31  ;;  %v368_v58 = vand.u32 2147483647, %v1929_v25  ;;  %v960_v47 = vadd.f32 %v959_v32, %v958_v0 }
 0x150   :  { %v1260_v39 = vpop.eup %1259  ;;  %v829_v22 = vsub.f32 %v1802_v21, %v1912_v2  ;;  %v887_v43 = vadd.f32 %v886_v15, %v885_v30  ;;  %1277 = vpow2.f32 %v389_v5  ;;  %v996_v35 = vsel %vm930_vm1, %v856_v44, 0.0 }
 0x151   :  { %v1262_v16 = vpop.eup %1261  ;;  %v812_v57 = vsub.f32 %v1852_v7, %v752_v1  ;;  %v770_v11 = vmul.f32 0.6931472, %v1254_v4  ;;  %1279 = vlog2.f32 %v712_v42  ;;  %v1051_v55 = vadd.f32 %v945_v13, %v880_v14 }
 0x152   :  { %v1264_v45 = vpop.eup %1263  ;;  %v1052_v53 = vadd.f32 %v960_v47, %v887_v43  ;;  %v406_v19 = vmul.f32 0.6931472, %v1262_v16  ;;  %v376_v8 = vsub.f32 0.0, %v368_v58  ;;  %v982_v0 = vadd.f32 %v1902_v10, %v1776_v20 }
 0x153   :  { %v1266_v24 = vpop.eup %1265  ;;  %v972_v29 = vrot.slane %v971_v59, 2  ;;  %v865_v21 = vmax.f32 %v825_v27, -20.723267  ;;  %v762_v2 = vmul.f32 0.6931472, %v1258_v6  ;;  %v1010_v4 = vadd.f32 %v1921_v41, %v1795_v40 }
 0x154   :  { %v1943_v48 = vsel %vm1068_vm3, %v1052_v53, %v1051_v55  ;;  %v772_v28 = vmul.f32 0.6931472, %v1260_v39  ;;  %v419_v7 = vsub.f32 %v355_v36, %v406_v19  ;;  %v391_v50 = vmul.f32 1.442695, %v376_v8 }
 0x155   :  { %v1268_v46 = vpop.eup %1267  ;;  %v1949_v32 = vmax.f32 %v829_v22, -20.723267  ;;  %v997_v30 = vadd.f32 %v996_v35, %v1845_v9  ;;  %v852_v20 = vmax.f32 %v812_v57, -20.723267  ;;  %v821_v10 = vsub.f32 %v1856_v49, %v770_v11 }
 0x156   :  { %v780_v60 = vmul.f32 0.6931472, %v1266_v24  ;;  %v427_v44 = vmax.f32 %v419_v7, -20.723267  ;;  %1281 = vpow2.f32 %v391_v50  ;;  %v1024_v23 = vsel %vm930_vm1, %v865_v21, 0.0 }
 0x157   :  { %v1270_v1 = vpop.eup %1269  ;;  %v817_v18 = vsub.f32 %v1873_v33, %v762_v2  ;;  %v507_v36 = vmin.f32 %v467_v52, 0.0  ;;  %v356_v40 = vmin.f32 %v1858_v51, 0.0  ;;  %v973_v31 = vadd.f32 %v972_v29, %v971_v59 }
 0x158   :  { %v1272_v41 = vpop.eup %1271  ;;  %v788_v13 = vmul.f32 0.6931472, %v1264_v45  ;;  %v822_v9 = vsub.f32 %v1891_v26, %v772_v28  ;;  %v888_v49 = vsel %vm873_vm2, %v427_v44, 0.0  ;;  %v782_v5 = vmul.f32 0.6931472, %v1270_v1 }
 0x159   :  { %v1274_v27 = vpop.eup %1273  ;;  %v889_v15 = vrot.slane %v888_v49, 4  ;;  %v408_v6 = vmul.f32 0.6931472, %v1272_v41  ;;  %v512_v14 = vmin.f32 %v472_v38, 0.0  ;;  %v983_v63 = vsel %vm930_vm1, %v852_v20, 0.0 }
 0x15a   :  { %v1276_v33 = vpop.eup %1275  ;;  %v861_v52 = vmax.f32 %v821_v10, -20.723267  ;;  %v826_v51 = vsub.f32 %v1881_v62, %v780_v60  ;;  %v397_v42 = vadd.f32 1.0, %v1274_v27  ;;  %v857_v59 = vmax.f32 %v817_v18, -20.723267 }
 0x15b   :  { %v890_v58 = vadd.f32 %v889_v15, %v888_v49  ;;  %v420_v39 = vsub.f32 %v356_v40, %v408_v6  ;;  %v398_v26 = vadd.f32 1.0, %v1276_v33  ;;  %v830_v47 = vsub.f32 %v1862_v17, %v788_v13 }
 0x15c   :  { %v862_v22 = vmax.f32 %v822_v9, -20.723267  ;;  %v790_v43 = vmul.f32 0.6931472, %v1268_v46  ;;  %1283 = vlog2.f32 %v397_v42  ;;  %v827_v38 = vsub.f32 %v507_v36, %v782_v5 }
 0x15d   :  { %v1278_v16 = vpop.eup %1277  ;;  %v891_v37 = vrot.slane %v890_v58, 2  ;;  %v428_v35 = vmax.f32 %v420_v39, -20.723267  ;;  %1285 = vlog2.f32 %v398_v26  ;;  %v974_v11 = vrot.slane %v973_v31, 1 }
 0x15e   :  { %v1280_v57 = vpop.eup %1279  ;;  %v984_v45 = vadd.f32 %v983_v63, %v982_v0  ;;  %v1011_v62 = vsel %vm930_vm1, %v861_v52, 0.0  ;;  %v399_v55 = vadd.f32 1.0, %v1278_v16  ;;  %v998_v53 = vsel %vm930_vm1, %v857_v59, 0.0 }
 0x15f   :  { %v866_v19 = vmax.f32 %v826_v51, -20.723267  ;;  %v892_v8 = vadd.f32 %v891_v37, %v890_v58  ;;  %v792_v17 = vmul.f32 0.6931472, %v1280_v57  ;;  %v1013_v24 = vsel %vm930_vm1, %v862_v22, 0.0 }
 0x160   :  { %v831_v29 = vsub.f32 %v1898_v56, %v790_v43  ;;  %v895_v21 = vsel %vm873_vm2, %v428_v35, 0.0  ;;  %1287 = vlog2.f32 %v399_v55  ;;  %v1012_v2 = vadd.f32 %v1011_v62, %v1010_v4 }
 0x161   :  { %v870_v28 = vmax.f32 %v830_v47, -20.723267  ;;  %v893_v7 = vrot.slane %v892_v8, 1  ;;  %v867_v50 = vmax.f32 %v827_v38, -20.723267  ;;  %v1036_v0 = vsel %vm930_vm1, %v1910_v12, 0.0 }
 0x162   :  { %v975_v46 = vadd.f32 %v974_v11, %v973_v31  ;;  %v999_v20 = vadd.f32 %v998_v53, %v997_v30  ;;  %v832_v10 = vsub.f32 %v512_v14, %v792_v17  ;;  %v1026_v44 = vsel %vm930_vm1, %v866_v19, 0.0 }
 0x163   :  { %v1282_v60 = vpop.eup %1281  ;;  %v1014_v1 = vadd.f32 %v1013_v24, %v1012_v2  ;;  %v894_v18 = vadd.f32 %v893_v7, %v892_v8  ;;  %v896_v36 = vrot.slane %v895_v21, 4  ;;  %v1037_v56 = vsel %vm930_vm1, %v1949_v32, 0.0 }
 0x164   :  { %v1025_v4 = vadd.f32 %v1024_v23, %v1887_v54  ;;  %v871_v40 = vmax.f32 %v831_v29, -20.723267  ;;  %v400_v41 = vadd.f32 1.0, %v1282_v60  ;;  %v985_v13 = vrot.slane %v984_v45, 4 }
 0x165   :  { %v1039_v9 = vsel %vm930_vm1, %v870_v28, 0.0  ;;  %v1053_v12 = vadd.f32 %v975_v46, %v894_v18  ;;  %v1028_v30 = vsel %vm930_vm1, %v867_v50, 0.0  ;;  %v1000_v31 = vrot.slane %v999_v20, 4 }
 0x166   :  { %v1027_v49 = vadd.f32 %v1026_v44, %v1025_v4  ;;  %v872_v27 = vmax.f32 %v832_v10, -20.723267  ;;  %1289 = vlog2.f32 %v400_v41  ;;  %v1038_v15 = vadd.f32 %v1037_v56, %v1036_v0 }
 0x167   :  { %v1015_v5 = vrot.slane %v1014_v1, 4  ;;  %v1980_v6 = vsel %vm1070_vm4, %v1053_v12, %v1943_v48  ;;  %v897_v32 = vadd.f32 %v896_v36, %v895_v21  ;;  %v1041_v54 = vsel %vm930_vm1, %v871_v40, 0.0 }
 0x168   :  { %v1029_v23 = vadd.f32 %v1028_v30, %v1027_v49  ;;  %v986_v33 = vadd.f32 %v985_v13, %v984_v45  ;;  %v1040_v63 = vadd.f32 %v1039_v9, %v1038_v15  ;;  %v357_v52 = vmin.f32 %v1908_v34, 0.0 }
 0x169   :  { %v1284_v14 = vpop.eup %1283  ;;  %v1001_v42 = vadd.f32 %v1000_v31, %v999_v20  ;;  %v1043_v59 = vsel %vm930_vm1, %v872_v27, 0.0  ;;  %v358_v39 = vmin.f32 %v1916_v61, 0.0  ;;  %v1016_v26 = vadd.f32 %v1015_v5, %v1014_v1 }
 0x16a   :  { %v1286_v51 = vpop.eup %1285  ;;  %v410_v58 = vmul.f32 0.6931472, %v1284_v14  ;;  %v1042_v47 = vadd.f32 %v1041_v54, %v1040_v63  ;;  %v898_v48 = vrot.slane %v897_v32, 2  ;;  %v1030_v43 = vrot.slane %v1029_v23, 4 }
 0x16b   :  { %v412_v22 = vmul.f32 0.6931472, %v1286_v51  ;;  %v987_v38 = vrot.slane %v986_v33, 2  ;;  %v1002_v11 = vrot.slane %v1001_v42, 2  ;;  %v359_v34 = vmin.f32 %v1925_v3, 0.0 }
 0x16c   :  { %v421_v16 = vsub.f32 %v357_v52, %v410_v58  ;;  %v1044_v35 = vadd.f32 %v1043_v59, %v1042_v47  ;;  %v1017_v55 = vrot.slane %v1016_v26, 2  ;;  %v899_v53 = vadd.f32 %v898_v48, %v897_v32 }
 0x16d   :  { %v1288_v37 = vpop.eup %1287  ;;  %v422_v57 = vsub.f32 %v358_v39, %v412_v22  ;;  %v1031_v8 = vadd.f32 %v1030_v43, %v1029_v23  ;;  %v988_v24 = vadd.f32 %v987_v38, %v986_v33  ;;  %v1003_v28 = vadd.f32 %v1002_v11, %v1001_v42 }
 0x16e   :  { %v429_v45 = vmax.f32 %v421_v16, -20.723267  ;;  %v414_v62 = vmul.f32 0.6931472, %v1288_v37  ;;  %v1045_v29 = vrot.slane %v1044_v35, 4  ;;  %v1018_v46 = vadd.f32 %v1017_v55, %v1016_v26 }
 0x16f   :  { %v430_v19 = vmax.f32 %v422_v57, -20.723267  ;;  %v900_v20 = vrot.slane %v899_v53, 1  ;;  %v360_v10 = vmin.f32 %v1929_v25, 0.0  ;;  %v1032_v60 = vrot.slane %v1031_v8, 2 }
 0x170   :  { %v902_v61 = vsel %vm873_vm2, %v429_v45, 0.0  ;;  %v423_v17 = vsub.f32 %v359_v34, %v414_v62  ;;  %v989_v36 = vrot.slane %v988_v24, 1  ;;  %v1046_v56 = vadd.f32 %v1045_v29, %v1044_v35 }
 0x171   :  { %v903_v21 = vrot.slane %v902_v61, 4  ;;  %v909_v2 = vsel %vm873_vm2, %v430_v19, 0.0  ;;  %v1004_v41 = vrot.slane %v1003_v28, 1  ;;  %v901_v12 = vadd.f32 %v900_v20, %v899_v53 }
 0x172   :  { %v910_v7 = vrot.slane %v909_v2, 4  ;;  %v431_v50 = vmax.f32 %v423_v17, -20.723267  ;;  %v1019_v49 = vrot.slane %v1018_v46, 1  ;;  %v1033_v27 = vadd.f32 %v1032_v60, %v1031_v8 }
 0x173   :  { %v1290_v0 = vpop.eup %1289  ;;  %v904_v3 = vadd.f32 %v903_v21, %v902_v61  ;;  %v990_v25 = vadd.f32 %v989_v36, %v988_v24  ;;  %v1047_v32 = vrot.slane %v1046_v56, 2  ;;  %v1005_v14 = vadd.f32 %v1004_v41, %v1003_v28 }
 0x174   :  { %v911_v44 = vadd.f32 %v910_v7, %v909_v2  ;;  %v916_v1 = vsel %vm873_vm2, %v431_v50, 0.0  ;;  %v416_v18 = vmul.f32 0.6931472, %v1290_v0  ;;  %v1020_v58 = vadd.f32 %v1019_v49, %v1018_v46 }
 0x175   :  { %v905_v4 = vrot.slane %v904_v3, 2  ;;  %v917_v40 = vrot.slane %v916_v1, 4  ;;  %v1054_v52 = vadd.f32 %v990_v25, %v901_v12  ;;  %v1034_v39 = vrot.slane %v1033_v27, 1 }
 0x176   :  { %v912_v13 = vrot.slane %v911_v44, 2  ;;  %v424_v9 = vsub.f32 %v360_v10, %v416_v18  ;;  %v1048_v47 = vadd.f32 %v1047_v32, %v1046_v56 }
 0x177   :  { %v906_v30 = vadd.f32 %v905_v4, %v904_v3  ;;  %v918_v31 = vadd.f32 %v917_v40, %v916_v1  ;;  %v1073_v16 = vsel %vm1072_vm5, %v1054_v52, %v1980_v6  ;;  %v1035_v11 = vadd.f32 %v1034_v39, %v1033_v27  ;;  %v1059_v6 = vld [vmem:[%s2004_s4] sm:$0xff] }
 0x178   :  { %v913_v15 = vadd.f32 %v912_v13, %v911_v44  ;;  %v432_v5 = vmax.f32 %v424_v9, -20.723267  ;;  %v1049_v45 = vrot.slane %v1048_v47, 1 }
 0x179   :  { %v907_v54 = vrot.slane %v906_v30, 1  ;;  %v919_v23 = vrot.slane %v918_v31, 2 }
 0x17a   :  { %v914_v33 = vrot.slane %v913_v15, 1  ;;  %v923_v63 = vsel %vm873_vm2, %v432_v5, 0.0  ;;  %v1050_v19 = vadd.f32 %v1049_v45, %v1048_v47 }
 0x17b   :  { %v908_v51 = vadd.f32 %v907_v54, %v906_v30  ;;  %v920_v42 = vadd.f32 %v919_v23, %v918_v31  ;;  %v924_v59 = vrot.slane %v923_v63, 4 }
 0x17c   :  { %v915_v26 = vadd.f32 %v914_v33, %v913_v15 }
 0x17d   :  { %v1055_v48 = vadd.f32 %v1005_v14, %v908_v51  ;;  %v921_v22 = vrot.slane %v920_v42, 1  ;;  %v925_v43 = vadd.f32 %v924_v59, %v923_v63 }
 0x17e   :  { %v1056_v37 = vadd.f32 %v1020_v58, %v915_v26 }
 0x17f   :  { %v922_v38 = vadd.f32 %v921_v22, %v920_v42  ;;  %v926_v35 = vrot.slane %v925_v43, 2  ;;  %v1075_v57 = vsel %vm1074_vm6, %v1055_v48, %v1073_v16 }
 0x180   :  { %v1077_v55 = vsel %vm1076_vm7, %v1056_v37, %v1075_v57 }
 0x181   :  { %v927_v34 = vadd.f32 %v926_v35, %v925_v43  ;;  %v1057_v62 = vadd.f32 %v1035_v11, %v922_v38 }
 0x183   :  { %v928_v53 = vrot.slane %v927_v34, 1  ;;  %v1079_v61 = vsel %vm1078_vm8, %v1057_v62, %v1077_v55 }
 0x185   :  { %v929_v8 = vadd.f32 %v928_v53, %v927_v34 }
 0x187   :  { %v1058_v17 = vadd.f32 %v1050_v19, %v929_v8 }
 0x189   :  { %v1081_v24 = vsel %vm1080_vm9, %v1058_v17, %v1079_v61 }
 0x18a   :  { %v1083_v29 = vmul.f32 %v1081_v24, %v1059_v6 }
 0x18c   :  { %1084 = vst.msk [vmem:[%s2005_s5] sm:$0xff] %vm930_vm1, %v1083_v29 }
 0x18d   :  { %1089 = vsyncpa [#allocation3], 1 }
 0x18e   :  { %1090 = vsyncpa [#allocation5], 1 }

</bundles_post_ra>
